<compile_context>
chip_gen: v7x
topology: tpu7x:2x2x1
jax: 0.10.0
libtpu: 0.0.40
codegen_flags: <defaults>
</compile_context>

<pallas_src>
import functools

import jax
import jax.numpy as jnp
from jax.experimental import pallas as pl
from jax.experimental.pallas import tpu as pltpu

NEG_SLOPE = 0.01  # PyTorch nn.LeakyReLU default

# Logical (PyTorch) layer widths and the 128-lane padded output widths.
DIMS = (1000, 500, 200, 100)
PAD_OUT = (512, 256, 128)          # padded widths of layer outputs
D_IN = DIMS[0]                     # x feature dim stays unpadded (1000)


def _round_up(x, m):
    return (x + m - 1) // m * m


def _cdiv(a, b):
    return -(-a // b)


def _leaky_relu(x):
    return jnp.where(x > 0, x, NEG_SLOPE * x)


# --------------------------------------------------------------------------
# Kernel: fused 3-layer MLP on one batch tile; weights resident in VMEM.
# --------------------------------------------------------------------------
def encoder_kernel(x_ref, w1_ref, b1_ref, w2_ref, b2_ref, w3_ref, b3_ref,
                   o_ref):
    # Cast the f32 activation tile to the MXU input dtype in-kernel.
    x = x_ref[...].astype(w1_ref.dtype)

    # Layer 1: [bt,1000] @ [1000,512] -> f32 accumulate on the MXU.
    h = jnp.dot(x, w1_ref[...], preferred_element_type=jnp.float32)
    h = _leaky_relu(h + b1_ref[...])

    # Layer 2: [bt,512] @ [512,256].
    h = jnp.dot(h.astype(w2_ref.dtype), w2_ref[...],
                preferred_element_type=jnp.float32)
    h = _leaky_relu(h + b2_ref[...])

    # Layer 3: [bt,256] @ [256,128].
    h = jnp.dot(h.astype(w3_ref.dtype), w3_ref[...],
                preferred_element_type=jnp.float32)
    h = _leaky_relu(h + b3_ref[...])

    o_ref[...] = h.astype(o_ref.dtype)  # lane-dense, unmasked 128-wide store


# --------------------------------------------------------------------------
# One-time parameter preparation (hoisted out of the forward path).
# --------------------------------------------------------------------------
def prepare_params(params, compute_dtype=jnp.bfloat16):
    """Pad weights/biases to 128-lane multiples and cast weights to bf16.

    Call ONCE (e.g. at init); pass the result to `encoder_forward`.
    params = (w1, b1, w2, b2, w3, b3) with w_i already transposed to [in, out].
    """
    w1, b1, w2, b2, w3, b3 = params
    assert w1.shape == (DIMS[0], DIMS[1])
    assert w2.shape == (DIMS[1], DIMS[2])
    assert w3.shape == (DIMS[2], DIMS[3])

    def pad_w(w, rows, cols):
        out = jnp.zeros((rows, cols), compute_dtype)
        return out.at[:w.shape[0], :w.shape[1]].set(w.astype(compute_dtype))

    def pad_b(b, cols):
        out = jnp.zeros((1, cols), jnp.float32)
        return out.at[:, :b.shape[0]].set(b.reshape(1, -1).astype(jnp.float32))

    w1p = pad_w(w1, D_IN, PAD_OUT[0])          # [1000, 512]
    w2p = pad_w(w2, PAD_OUT[0], PAD_OUT[1])    # [512, 256]
    w3p = pad_w(w3, PAD_OUT[1], PAD_OUT[2])    # [256, 128]
    b1p = pad_b(b1, PAD_OUT[0])
    b2p = pad_b(b2, PAD_OUT[1])
    b3p = pad_b(b3, PAD_OUT[2])
    return (w1p, b1p, w2p, b2p, w3p, b3p)


# --------------------------------------------------------------------------
# Batch-tile selection (balanced tiles, multiple of 16, >=2 steps for v7x).
# --------------------------------------------------------------------------
def _choose_batch_tile(B, target):
    target = max(16, _round_up(int(target), 16))
    n_tiles = max(1, _cdiv(B, target))
    if B >= 256:
        if n_tiles == 1:
            n_tiles = 2                 # let both v7x TensorCores work
        elif n_tiles % 2 == 1:
            n_tiles += 1                # even split across 2 cores
    return _round_up(_cdiv(B, n_tiles), 16)


def _const_spec(shape):
    """BlockSpec for a grid-invariant operand; single-buffered if supported."""
    index_map = lambda i: (0, 0)
    try:
        return pl.BlockSpec(shape, index_map, pipeline_mode=pl.Buffered(1))
    except TypeError:
        return pl.BlockSpec(shape, index_map)


# --------------------------------------------------------------------------
# Forward pass.
# --------------------------------------------------------------------------
@functools.partial(jax.jit, static_argnames=("batch_tile",))
def encoder_forward(x, padded_params, *, batch_tile=512):
    """x: [B, 1000] float32 -> [B, 100] float32.

    `padded_params` must come from `prepare_params` (done once, not per call).
    """
    w1p, b1p, w2p, b2p, w3p, b3p = padded_params
    B, d_in = x.shape
    assert d_in == D_IN

    bt = _choose_batch_tile(B, batch_tile)
    B_pad = _round_up(B, bt)
    grid = (B_pad // bt,)
    if B_pad != B:                      # only the batch dim ever gets padded
        x = jnp.pad(x, ((0, B_pad - B), (0, 0)))

    # ---- cost estimate & VMEM sizing -------------------------------------
    w_elems = D_IN * PAD_OUT[0] + PAD_OUT[0] * PAD_OUT[1] + PAD_OUT[1] * PAD_OUT[2]
    flops = 2 * B_pad * w_elems
    bytes_accessed = (B_pad * D_IN * 4          # x (f32, read once)
                      + w_elems * 2             # bf16 weights
                      + sum(PAD_OUT) * 4        # f32 biases
                      + B_pad * PAD_OUT[2] * 4) # f32 output
    cost = pl.CostEstimate(flops=flops, transcendentals=0,
                           bytes_accessed=bytes_accessed)

    vmem_bytes = (2 * bt * D_IN * 4             # x double buffer (f32)
                  + 2 * bt * PAD_OUT[2] * 4     # out double buffer (f32)
                  + 2 * w_elems * 2             # weights (worst case 2 bufs)
                  + 8 * bt * PAD_OUT[0] * 4)    # activation temps / headroom
    vmem_limit = int(min(max(_round_up(vmem_bytes, 1 << 20), 16 << 20), 48 << 20))

    def x_map(i):
        return (i, 0)

    out = pl.pallas_call(
        encoder_kernel,
        out_shape=jax.ShapeDtypeStruct((B_pad, PAD_OUT[2]), jnp.float32),
        grid_spec=pltpu.PrefetchScalarGridSpec(
            num_scalar_prefetch=0,
            grid=grid,
            in_specs=[
                pl.BlockSpec((bt, D_IN), x_map),   # x tile, raw f32, full lanes
                _const_spec(w1p.shape),            # W1 [1000,512] bf16
                _const_spec(b1p.shape),            # b1 [1,512]    f32
                _const_spec(w2p.shape),            # W2 [512,256]  bf16
                _const_spec(b2p.shape),            # b2 [1,256]    f32
                _const_spec(w3p.shape),            # W3 [256,128]  bf16
                _const_spec(b3p.shape),            # b3 [1,128]    f32
            ],
            out_specs=pl.BlockSpec((bt, PAD_OUT[2]), x_map),
        ),
        compiler_params=pltpu.CompilerParams(
            dimension_semantics=("parallel",),
            vmem_limit_bytes=vmem_limit,
        ),
        cost_estimate=cost,
    )(x, w1p, b1p, w2p, b2p, w3p, b3p)

    # Slice off batch padding and the 28 zero output lanes.
    return out[:B, :DIMS[3]]


# --------------------------------------------------------------------------
# Init / reference / self-test.
# --------------------------------------------------------------------------
def init_params(key):
    """nn.Linear-style init (uniform +-1/sqrt(fan_in)); weights are [in, out]."""
    dims = [(DIMS[0], DIMS[1]), (DIMS[1], DIMS[2]), (DIMS[2], DIMS[3])]
    params = []
    keys = jax.random.split(key, 2 * len(dims))
    for li, (fan_in, fan_out) in enumerate(dims):
        bound = 1.0 / (fan_in ** 0.5)
        w = jax.random.uniform(keys[2 * li], (fan_in, fan_out),
                               minval=-bound, maxval=bound, dtype=jnp.float32)
        b = jax.random.uniform(keys[2 * li + 1], (fan_out,),
                               minval=-bound, maxval=bound, dtype=jnp.float32)
        params.extend([w, b])
    return tuple(params)


def reference_forward(x, params, compute_dtype=jnp.bfloat16):
    """Pure-JAX reference mirroring the kernel's bf16-in / f32-accumulate math."""
    w1, b1, w2, b2, w3, b3 = params
    h = x
    for w, b in ((w1, b1), (w2, b2), (w3, b3)):
        h = jnp.dot(h.astype(compute_dtype), w.astype(compute_dtype),
                    preferred_element_type=jnp.float32)
        h = jax.nn.leaky_relu(h + b.reshape(1, -1).astype(jnp.float32),
                              NEG_SLOPE)
    return h


if __name__ == "__main__":
    key = jax.random.PRNGKey(0)
    k_params, k_x1, k_x2 = jax.random.split(key, 3)

    params = init_params(k_params)
    padded_params = prepare_params(params)   # one-time padding / bf16 cast

    # Small batch (pads 10 -> 16 rows) and a batch just above the old tile
    # boundary (300 -> 2 balanced tiles of 160) to exercise the grid logic.
    for batch, kx in ((10, k_x1), (300, k_x2)):
        x = jax.random.normal(kx, (batch, DIMS[0]), dtype=jnp.float32)
        out = jax.block_until_ready(encoder_forward(x, padded_params))
        ref = reference_forward(x, params)
        assert out.shape == (batch, DIMS[3]), out.shape
        max_err = float(jnp.max(jnp.abs(out - ref)))
        assert jnp.allclose(out, ref, atol=5e-3, rtol=5e-3), max_err

    print("KERNEL_OK")
</pallas_src>

<mosaic_0001>
module attributes {stable_mosaic.version = 11 : i64} {
  func.func @encoder_kernel(%arg0: i32, %arg1: memref<16x1000xf32, #tpu.memory_space<vmem>>, %arg2: memref<1000x512xbf16, #tpu.memory_space<vmem>>, %arg3: memref<1x512xf32, #tpu.memory_space<vmem>>, %arg4: memref<512x256xbf16, #tpu.memory_space<vmem>>, %arg5: memref<1x256xf32, #tpu.memory_space<vmem>>, %arg6: memref<256x128xbf16, #tpu.memory_space<vmem>>, %arg7: memref<1x128xf32, #tpu.memory_space<vmem>>, %arg8: memref<16x128xf32, #tpu.memory_space<vmem>>) attributes {dimension_semantics = [#tpu.dimension_semantics<parallel>], iteration_bounds = array<i64: 1>, scalar_prefetch = 0 : i64, scratch_operands = 0 : i64, tpu.core_type = #tpu.core_type<tc>, window_params = [{transform_indices = @transform_0, window_bounds = array<i64: 16, 1000>}, {pipeline_mode = #tpu.pipeline_mode<synchronous>, transform_indices = @transform_1, window_bounds = array<i64: 1000, 512>}, {pipeline_mode = #tpu.pipeline_mode<synchronous>, transform_indices = @transform_2, window_bounds = array<i64: 1, 512>}, {pipeline_mode = #tpu.pipeline_mode<synchronous>, transform_indices = @transform_3, window_bounds = array<i64: 512, 256>}, {pipeline_mode = #tpu.pipeline_mode<synchronous>, transform_indices = @transform_4, window_bounds = array<i64: 1, 256>}, {pipeline_mode = #tpu.pipeline_mode<synchronous>, transform_indices = @transform_5, window_bounds = array<i64: 256, 128>}, {pipeline_mode = #tpu.pipeline_mode<synchronous>, transform_indices = @transform_6, window_bounds = array<i64: 1, 128>}, {transform_indices = @transform_7, window_bounds = array<i64: 16, 128>}]} {
    %c0 = arith.constant 0 : index
    %c0_0 = arith.constant 0 : index
    %0 = vector.load %arg1[%c0, %c0_0] : memref<16x1000xf32, #tpu.memory_space<vmem>>, vector<16x1000xf32>
    %1 = arith.truncf %0 : vector<16x1000xf32> to vector<16x1000xbf16>
    %c0_1 = arith.constant 0 : index
    %c0_2 = arith.constant 0 : index
    %2 = vector.load %arg2[%c0_1, %c0_2] : memref<1000x512xbf16, #tpu.memory_space<vmem>>, vector<1000x512xbf16>
    %cst = arith.constant dense<0.000000e+00> : vector<16x512xf32>
    %3 = tpu.matmul %1, %2, %cst {dimension_numbers = #tpu.dot_dimension_numbers<[1], [0], [0], [1], [0, 0, 1, 1], [], []>} : vector<16x1000xbf16>, vector<1000x512xbf16>, vector<16x512xf32> -> vector<16x512xf32>
    %c0_3 = arith.constant 0 : index
    %c0_4 = arith.constant 0 : index
    %4 = vector.load %arg3[%c0_3, %c0_4] : memref<1x512xf32, #tpu.memory_space<vmem>>, vector<1x512xf32>
    %5 = vector.broadcast %4 : vector<1x512xf32> to vector<16x512xf32>
    %6 = arith.addf %3, %5 : vector<16x512xf32>
    %cst_5 = arith.constant 0.000000e+00 : f32
    %7 = vector.broadcast %cst_5 : f32 to vector<16x512xf32>
    %8 = arith.cmpf ogt, %6, %7 : vector<16x512xf32>
    %cst_6 = arith.constant 0.00999999977 : f32
    %9 = vector.broadcast %cst_6 : f32 to vector<16x512xf32>
    %10 = arith.mulf %9, %6 : vector<16x512xf32>
    %11 = arith.select %8, %6, %10 : vector<16x512xi1>, vector<16x512xf32>
    %12 = arith.truncf %11 : vector<16x512xf32> to vector<16x512xbf16>
    %c0_7 = arith.constant 0 : index
    %c0_8 = arith.constant 0 : index
    %13 = vector.load %arg4[%c0_7, %c0_8] : memref<512x256xbf16, #tpu.memory_space<vmem>>, vector<512x256xbf16>
    %cst_9 = arith.constant dense<0.000000e+00> : vector<16x256xf32>
    %14 = tpu.matmul %12, %13, %cst_9 {dimension_numbers = #tpu.dot_dimension_numbers<[1], [0], [0], [1], [0, 0, 1, 1], [], []>} : vector<16x512xbf16>, vector<512x256xbf16>, vector<16x256xf32> -> vector<16x256xf32>
    %c0_10 = arith.constant 0 : index
    %c0_11 = arith.constant 0 : index
    %15 = vector.load %arg5[%c0_10, %c0_11] : memref<1x256xf32, #tpu.memory_space<vmem>>, vector<1x256xf32>
    %16 = vector.broadcast %15 : vector<1x256xf32> to vector<16x256xf32>
    %17 = arith.addf %14, %16 : vector<16x256xf32>
    %cst_12 = arith.constant 0.000000e+00 : f32
    %18 = vector.broadcast %cst_12 : f32 to vector<16x256xf32>
    %19 = arith.cmpf ogt, %17, %18 : vector<16x256xf32>
    %cst_13 = arith.constant 0.00999999977 : f32
    %20 = vector.broadcast %cst_13 : f32 to vector<16x256xf32>
    %21 = arith.mulf %20, %17 : vector<16x256xf32>
    %22 = arith.select %19, %17, %21 : vector<16x256xi1>, vector<16x256xf32>
    %23 = arith.truncf %22 : vector<16x256xf32> to vector<16x256xbf16>
    %c0_14 = arith.constant 0 : index
    %c0_15 = arith.constant 0 : index
    %24 = vector.load %arg6[%c0_14, %c0_15] : memref<256x128xbf16, #tpu.memory_space<vmem>>, vector<256x128xbf16>
    %cst_16 = arith.constant dense<0.000000e+00> : vector<16x128xf32>
    %25 = tpu.matmul %23, %24, %cst_16 {dimension_numbers = #tpu.dot_dimension_numbers<[1], [0], [0], [1], [0, 0, 1, 1], [], []>} : vector<16x256xbf16>, vector<256x128xbf16>, vector<16x128xf32> -> vector<16x128xf32>
    %c0_17 = arith.constant 0 : index
    %c0_18 = arith.constant 0 : index
    %26 = vector.load %arg7[%c0_17, %c0_18] : memref<1x128xf32, #tpu.memory_space<vmem>>, vector<1x128xf32>
    %27 = vector.broadcast %26 : vector<1x128xf32> to vector<16x128xf32>
    %28 = arith.addf %25, %27 : vector<16x128xf32>
    %cst_19 = arith.constant 0.000000e+00 : f32
    %29 = vector.broadcast %cst_19 : f32 to vector<16x128xf32>
    %30 = arith.cmpf ogt, %28, %29 : vector<16x128xf32>
    %cst_20 = arith.constant 0.00999999977 : f32
    %31 = vector.broadcast %cst_20 : f32 to vector<16x128xf32>
    %32 = arith.mulf %31, %28 : vector<16x128xf32>
    %33 = arith.select %30, %28, %32 : vector<16x128xi1>, vector<16x128xf32>
    %c0_21 = arith.constant 0 : index
    %c0_22 = arith.constant 0 : index
    %34 = vector.load %arg8[%c0_21, %c0_22] : memref<16x128xf32, #tpu.memory_space<vmem>>, vector<16x128xf32>
    tpu.vector_store %arg8[%c0_21, %c0_22], %33 {strides = array<i32>} : memref<16x128xf32, #tpu.memory_space<vmem>>, vector<16x128xf32>,
    return
  }
  func.func @transform_0(%arg0: i32) -> (i32, i32) {
    %c0_i32 = arith.constant 0 : i32
    %c0_i32_0 = arith.constant 0 : i32
    return %arg0, %c0_i32 : i32, i32
  }
  func.func @transform_1(%arg0: i32) -> (i32, i32) {
    %c0_i32 = arith.constant 0 : i32
    %c0_i32_0 = arith.constant 0 : i32
    %c0_i32_1 = arith.constant 0 : i32
    return %c0_i32, %c0_i32_0 : i32, i32
  }
  func.func @transform_2(%arg0: i32) -> (i32, i32) {
    %c0_i32 = arith.constant 0 : i32
    %c0_i32_0 = arith.constant 0 : i32
    %c0_i32_1 = arith.constant 0 : i32
    return %c0_i32, %c0_i32_0 : i32, i32
  }
  func.func @transform_3(%arg0: i32) -> (i32, i32) {
    %c0_i32 = arith.constant 0 : i32
    %c0_i32_0 = arith.constant 0 : i32
    %c0_i32_1 = arith.constant 0 : i32
    return %c0_i32, %c0_i32_0 : i32, i32
  }
  func.func @transform_4(%arg0: i32) -> (i32, i32) {
    %c0_i32 = arith.constant 0 : i32
    %c0_i32_0 = arith.constant 0 : i32
    %c0_i32_1 = arith.constant 0 : i32
    return %c0_i32, %c0_i32_0 : i32, i32
  }
  func.func @transform_5(%arg0: i32) -> (i32, i32) {
    %c0_i32 = arith.constant 0 : i32
    %c0_i32_0 = arith.constant 0 : i32
    %c0_i32_1 = arith.constant 0 : i32
    return %c0_i32, %c0_i32_0 : i32, i32
  }
  func.func @transform_6(%arg0: i32) -> (i32, i32) {
    %c0_i32 = arith.constant 0 : i32
    %c0_i32_0 = arith.constant 0 : i32
    %c0_i32_1 = arith.constant 0 : i32
    return %c0_i32, %c0_i32_0 : i32, i32
  }
  func.func @transform_7(%arg0: i32) -> (i32, i32) {
    %c0_i32 = arith.constant 0 : i32
    %c0_i32_0 = arith.constant 0 : i32
    return %arg0, %c0_i32 : i32, i32
  }
}

</mosaic_0001>

<bundles_post_ra>
// kernel: encoder_forward.1
= control target key start
LH: loop header
LB: loop body
LE: loop exit
PB: predicated region body
PF: predicated region fallthrough
CT: control target
= control target key end

     0   :  { %12 = vsyncpa [#allocation3], 0  ;;  %s3915_s0 = inlined_call_operand.vmem [shape: f32[16,1000], index: 0, kind: input, shape index: {}]   ;;  %s3916_s1 = inlined_call_operand.hbm [shape: bf16[1000,512], index: 1, kind: input, shape index: {}]   ;;  %s3917_s2 = inlined_call_operand.vmem [shape: f32[1,512], index: 2, kind: input, shape index: {}]   ;;  %s3918_s3 = inlined_call_operand.hbm [shape: bf16[512,256], index: 3, kind: input, shape index: {}]   ;;  %s3919_s4 = inlined_call_operand.vmem [shape: f32[1,256], index: 4, kind: input, shape index: {}]   ;;  %s3920_s5 = inlined_call_operand.vmem [shape: bf16[256,128], index: 5, kind: input, shape index: {}]   ;;  %s3921_s6 = inlined_call_operand.vmem [shape: f32[1,128], index: 6, kind: input, shape index: {}]   ;;  %s3922_s7 = inlined_call_operand.hbm [shape: f32[16,128], index: 7, kind: output, shape index: {}]  }
   0x1   :  { %13 = vsyncpa [#allocation6], 0 }
   0x2   :  { %14 = vsyncpa [#allocation4], 0  ;;  %s3655_s24 = smov [#allocation2]   ;;  %s3583_s28 = scalar_lea.hbm %s3916_s1, 32000 }
   0x3   :  { %s22_s25 = sshll.u32 %s3655_s24, 4  ;;  %p3584_p0 = scmp.ne.s32.totalorder %s3916_s1, %s3583_s28  ;;  %s23_s25 = int_to_ptr.vmem [resolvable:$true] %s22_s25 }
   0x4   :  { %p3587_p1 = scmp.lt.u32.totalorder %s3583_s28, %s3916_s1 }
   0x6   :  { %p3589_p2 = pnand %p3587_p1, %p3584_p0 }
   0x8   :  { %3592 = shalt.err (!%p3589_p2)
}
   0x9   :  { %s3593_s10 = scalar_lea.vmem %s23_s25, 32000  ;;  %p3598_p4 = scmp.lt.s32.totalorder %s23_s25, %s23_s25 }
   0xa   :  { %p3594_p3 = scmp.ne.s32.totalorder %s23_s25, %s3593_s10  ;;  %p3599_p5 = scmp.lt.s32.totalorder %s3593_s10, %s3593_s10 }
   0xc   :  { %p3600_p6 = por %p3599_p5, %p3598_p4 }
   0xe   :  { %p3601_p7 = pnand %p3600_p6, %p3594_p3 }
  0x10   :  { %3604 = shalt.err (!%p3601_p7)
}
  0x11   :  { %s3656_s11 = smov 256   ;;  %s3657_s12 = smov 16  }
  0x12   :  { %28 = dma.hbm_to_vmem [thread:$0]  %s3916_s1, 32000, %s23_s25, [#allocation3], %s3656_s11, %s3656_s11, %s3657_s12  }
  0x13   :  { %s3658_s15 = smov [#allocation5]   ;;  %s3605_s19 = scalar_lea.hbm %s3918_s3, 8192 }
  0x14   :  { %s36_s16 = sshll.u32 %s3658_s15, 4  ;;  %p3606_p8 = scmp.ne.s32.totalorder %s3918_s3, %s3605_s19  ;;  %s37_s16 = int_to_ptr.vmem [resolvable:$true] %s36_s16 }
  0x15   :  { %p3609_p9 = scmp.lt.u32.totalorder %s3605_s19, %s3918_s3 }
  0x17   :  { %p3611_p10 = pnand %p3609_p9, %p3606_p8 }
  0x19   :  { %3614 = shalt.err (!%p3611_p10)
}
  0x1a   :  { %s3615_s24 = scalar_lea.vmem %s37_s16, 8192  ;;  %p3620_p12 = scmp.lt.s32.totalorder %s37_s16, %s37_s16 }
  0x1b   :  { %p3616_p11 = scmp.ne.s32.totalorder %s37_s16, %s3615_s24  ;;  %p3621_p13 = scmp.lt.s32.totalorder %s3615_s24, %s3615_s24 }
  0x1d   :  { %p3622_p0 = por %p3621_p13, %p3620_p12 }
  0x1f   :  { %p3623_p1 = pnand %p3622_p0, %p3616_p11 }
  0x21   :  { %3626 = shalt.err (!%p3623_p1)
}
  0x22   :  { %s3659_s1 = smov 128   ;;  %s3660_s25 = smov 8  }
  0x23   :  { %42 = dma.hbm_to_vmem [thread:$0]  %s3918_s3, 8192, %s37_s16, [#allocation6], %s3659_s1, %s3659_s1, %s3660_s25  }
  0x24   :  { %3649 = dma.done.wait [#allocation3], 32000  }
  0x25   :  { %3650 = vsyncadd [#allocation3], 4294935296 }
  0x26   :  { %3651 = dma.done.wait [#allocation6], 8192  }
  0x27   :  { %3652 = vsyncadd [#allocation6], 4294959104  ;;  %v3095_v0 = vld [vmem:[#allocation2 + $0x4] ss:$16 sps:$4 sm:$0xff]   ;;  %v3099_v2 = vld [vmem:[#allocation2] ss:$16 sps:$4 sm:$0xff]  }
  0x28   :  { %v3097_v1 = vld [vmem:[#allocation2 + $0x604] ss:$16 sps:$4 sm:$0xff]   ;;  %1619 = vmatprep.subr.bf16.mxu0 %v3095_v0  ;;  %v3100_v3 = vld [vmem:[#allocation2 + $0x600] ss:$16 sps:$4 sm:$0xff]   ;;  %v63_v43 = vld [vmem:[%s3915_s0 + $0x38] sm:$0xff]  ;;  %vm1602_vm0 = vcmask 850944  }
  0x29   :  { %1748 = vmatprep.subr.bf16.mxu1 %v3097_v1  ;;  %v3101_v4 = vld [vmem:[#allocation2 + $0x24] ss:$16 sps:$4 sm:$0xff]   ;;  %1620 = vmatpush1.bf16.msra.mxu0 %v3099_v2  ;;  %v3105_v6 = vld [vmem:[#allocation2 + $0x20] ss:$16 sps:$4 sm:$0xff]   ;;  %v71_v44 = vld [vmem:[%s3915_s0 + $0x78] sm:$0xff]  ;;  %vm1606_vm1 = vcmask 1043456  }
  0x2a   :  { %1749 = vmatpush1.bf16.msra.mxu1 %v3100_v3  ;;  %v3103_v5 = vld [vmem:[#allocation2 + $0x624] ss:$16 sps:$4 sm:$0xff]   ;;  %1621 = vmatprep.subr.bf16.mxu0 %v3101_v4  ;;  %v3106_v7 = vld [vmem:[#allocation2 + $0x620] ss:$16 sps:$4 sm:$0xff]   ;;  %v3735_v47 = vpack.c.bf16 %v71_v44, %v63_v43  ;;  %v57_v50 = vld [vmem:[%s3915_s0 + $0x8] sm:$0xff]  ;;  %s3661_s22 = smov [#allocation7]  }
  0x2b   :  { %1750 = vmatprep.subr.bf16.mxu1 %v3103_v5  ;;  %v3107_v8 = vld [vmem:[#allocation2 + $0x44] ss:$16 sps:$4 sm:$0xff]   ;;  %v3111_v10 = vld [vmem:[#allocation2 + $0x40] ss:$16 sps:$4 sm:$0xff]   ;;  %v65_v51 = vld [vmem:[%s3915_s0 + $0x48] sm:$0xff]  ;;  %s2676_s23 = sshll.u32 %s3661_s22, 4  ;;  %s2677_s23 = int_to_ptr.vmem [resolvable:$true] %s2676_s23 }
  0x2c   :  { %v3109_v9 = vld [vmem:[#allocation2 + $0x644] ss:$16 sps:$4 sm:$0xff]   ;;  %v3112_v11 = vld [vmem:[#allocation2 + $0x640] ss:$16 sps:$4 sm:$0xff]   ;;  %2942 = vmatprep.mubr.msk.bf16.mxu1 %vm1602_vm0, %v3735_v47  ;;  %v73_v54 = vpack.c.bf16 %v65_v51, %v57_v50  ;;  %v3229_v43 = vld [vmem:[#allocation2 + $0xe8] ss:$16 sps:$4 sm:$0xff]   ;;  %p3632_p3 = scmp.lt.s32.totalorder %s2677_s23, %s2677_s23 }
  0x2d   :  { %1622 = vmatpush1.bf16.msra.mxu0 %v3105_v6  ;;  %v3113_v12 = vld [vmem:[#allocation2 + $0x64] ss:$16 sps:$4 sm:$0xff]   ;;  %v3117_v14 = vld [vmem:[#allocation2 + $0x60] ss:$16 sps:$4 sm:$0xff]   ;;  %v3243_v51 = vld [vmem:[#allocation2 + $0x12c] ss:$16 sps:$4 sm:$0xff]  }
  0x2e   :  { %1751 = vmatpush1.bf16.msra.mxu1 %v3106_v7  ;;  %1623 = vmatprep.subr.bf16.mxu0 %v3107_v8  ;;  %v3115_v13 = vld [vmem:[#allocation2 + $0x664] ss:$16 sps:$4 sm:$0xff]   ;;  %v3118_v15 = vld [vmem:[#allocation2 + $0x660] ss:$16 sps:$4 sm:$0xff]   ;;  %v3188_v7 = vld [vmem:[#allocation2 + $0xc] ss:$16 sps:$4 sm:$0xff]  }
  0x2f   :  { %1752 = vmatprep.subr.bf16.mxu1 %v3109_v9  ;;  %v3119_v16 = vld [vmem:[#allocation2 + $0x84] ss:$16 sps:$4 sm:$0xff]   ;;  %v3123_v18 = vld [vmem:[#allocation2 + $0x80] ss:$16 sps:$4 sm:$0xff]   ;;  %1651 = vmatprep.mubr.bf16.mxu0 %v73_v54  ;;  %v3186_v8 = vld [vmem:[#allocation2 + $0x8] ss:$16 sps:$4 sm:$0xff]  }
  0x30   :  { %v3121_v17 = vld [vmem:[#allocation2 + $0x684] ss:$16 sps:$4 sm:$0xff]   ;;  %v3124_v19 = vld [vmem:[#allocation2 + $0x680] ss:$16 sps:$4 sm:$0xff]   ;;  %s3627_s24 = scalar_lea.vmem %s2677_s23, 256 }
  0x31   :  { %1624 = vmatpush1.bf16.msra.mxu0 %v3111_v10  ;;  %v3125_v20 = vld [vmem:[#allocation2 + $0xa4] ss:$16 sps:$4 sm:$0xff]   ;;  %v3129_v22 = vld [vmem:[#allocation2 + $0xa0] ss:$16 sps:$4 sm:$0xff]   ;;  %p3628_p2 = scmp.ne.s32.totalorder %s2677_s23, %s3627_s24  ;;  %p3633_p4 = scmp.lt.s32.totalorder %s3627_s24, %s3627_s24 }
  0x32   :  { %1753 = vmatpush1.bf16.msra.mxu1 %v3112_v11  ;;  %1625 = vmatprep.subr.bf16.mxu0 %v3113_v12  ;;  %v3127_v21 = vld [vmem:[#allocation2 + $0x6a4] ss:$16 sps:$4 sm:$0xff]   ;;  %v3130_v23 = vld [vmem:[#allocation2 + $0x6a0] ss:$16 sps:$4 sm:$0xff]  }
  0x33   :  { %1754 = vmatprep.subr.bf16.mxu1 %v3115_v13  ;;  %v3131_v24 = vld [vmem:[#allocation2 + $0xc4] ss:$16 sps:$4 sm:$0xff]   ;;  %v3135_v26 = vld [vmem:[#allocation2 + $0xc0] ss:$16 sps:$4 sm:$0xff]   ;;  %p3634_p5 = por %p3633_p4, %p3632_p3 }
  0x34   :  { %v3133_v25 = vld [vmem:[#allocation2 + $0x6c4] ss:$16 sps:$4 sm:$0xff]   ;;  %v3136_v27 = vld [vmem:[#allocation2 + $0x6c0] ss:$16 sps:$4 sm:$0xff]  }
  0x35   :  { %1626 = vmatpush1.bf16.msra.mxu0 %v3117_v14  ;;  %v3137_v28 = vld [vmem:[#allocation2 + $0xe4] ss:$16 sps:$4 sm:$0xff]   ;;  %v3141_v30 = vld [vmem:[#allocation2 + $0xe0] ss:$16 sps:$4 sm:$0xff]   ;;  %v3195_v14 = vld [vmem:[#allocation2 + $0x2c] ss:$16 sps:$4 sm:$0xff]   ;;  %p3635_p6 = pnand %p3634_p5, %p3628_p2 }
  0x36   :  { %1755 = vmatpush1.bf16.msra.mxu1 %v3118_v15  ;;  %1627 = vmatprep.subr.bf16.mxu0 %v3119_v16  ;;  %v3139_v29 = vld [vmem:[#allocation2 + $0x6e4] ss:$16 sps:$4 sm:$0xff]   ;;  %v3142_v31 = vld [vmem:[#allocation2 + $0x6e0] ss:$16 sps:$4 sm:$0xff]  }
  0x37   :  { %1756 = vmatprep.subr.bf16.mxu1 %v3121_v17  ;;  %v3143_v32 = vld [vmem:[#allocation2 + $0x104] ss:$16 sps:$4 sm:$0xff]   ;;  %v3147_v34 = vld [vmem:[#allocation2 + $0x100] ss:$16 sps:$4 sm:$0xff]   ;;  %v3193_v17 = vld [vmem:[#allocation2 + $0x28] ss:$16 sps:$4 sm:$0xff]  }
  0x38   :  { %v3145_v33 = vld [vmem:[#allocation2 + $0x704] ss:$16 sps:$4 sm:$0xff]   ;;  %v3148_v35 = vld [vmem:[#allocation2 + $0x700] ss:$16 sps:$4 sm:$0xff]  }
  0x39   :  { %1628 = vmatpush1.bf16.msra.mxu0 %v3123_v18  ;;  %v3149_v36 = vld [vmem:[#allocation2 + $0x124] ss:$16 sps:$4 sm:$0xff]   ;;  %v3153_v38 = vld [vmem:[#allocation2 + $0x120] ss:$16 sps:$4 sm:$0xff]  }
  0x3a   :  { %1757 = vmatpush1.bf16.msra.mxu1 %v3124_v19  ;;  %1629 = vmatprep.subr.bf16.mxu0 %v3125_v20  ;;  %v3151_v37 = vld [vmem:[#allocation2 + $0x724] ss:$16 sps:$4 sm:$0xff]   ;;  %v3154_v39 = vld [vmem:[#allocation2 + $0x720] ss:$16 sps:$4 sm:$0xff]   ;;  %v3201_v19 = vld [vmem:[#allocation2 + $0x4c] ss:$16 sps:$4 sm:$0xff]  }
  0x3b   :  { %1758 = vmatprep.subr.bf16.mxu1 %v3127_v21  ;;  %v3155_v40 = vld [vmem:[#allocation2 + $0x144] ss:$16 sps:$4 sm:$0xff]   ;;  %v3159_v42 = vld [vmem:[#allocation2 + $0x140] ss:$16 sps:$4 sm:$0xff]   ;;  %v3199_v21 = vld [vmem:[#allocation2 + $0x48] ss:$16 sps:$4 sm:$0xff]  }
  0x3c   :  { %v3157_v41 = vld [vmem:[#allocation2 + $0x744] ss:$16 sps:$4 sm:$0xff]   ;;  %v3160_v45 = vld [vmem:[#allocation2 + $0x740] ss:$16 sps:$4 sm:$0xff]  }
  0x3d   :  { %1630 = vmatpush1.bf16.msra.mxu0 %v3129_v22  ;;  %v3161_v46 = vld [vmem:[#allocation2 + $0x164] ss:$16 sps:$4 sm:$0xff]   ;;  %v3165_v49 = vld [vmem:[#allocation2 + $0x160] ss:$16 sps:$4 sm:$0xff]  }
  0x3e   :  { %1759 = vmatpush1.bf16.msra.mxu1 %v3130_v23  ;;  %1631 = vmatprep.subr.bf16.mxu0 %v3131_v24  ;;  %v3163_v48 = vld [vmem:[#allocation2 + $0x764] ss:$16 sps:$4 sm:$0xff]   ;;  %v3166_v52 = vld [vmem:[#allocation2 + $0x760] ss:$16 sps:$4 sm:$0xff]   ;;  %v3207_v23 = vld [vmem:[#allocation2 + $0x6c] ss:$16 sps:$4 sm:$0xff]  }
  0x3f   :  { %1760 = vmatprep.subr.bf16.mxu1 %v3133_v25  ;;  %v3167_v53 = vld [vmem:[#allocation2 + $0x184] ss:$16 sps:$4 sm:$0xff]   ;;  %v3171_v56 = vld [vmem:[#allocation2 + $0x180] ss:$16 sps:$4 sm:$0xff]   ;;  %v3205_v25 = vld [vmem:[#allocation2 + $0x68] ss:$16 sps:$4 sm:$0xff]  }
  0x40   :  { %v3169_v55 = vld [vmem:[#allocation2 + $0x784] ss:$16 sps:$4 sm:$0xff]   ;;  %v3172_v57 = vld [vmem:[#allocation2 + $0x780] ss:$16 sps:$4 sm:$0xff]  }
  0x41   :  { %1632 = vmatpush1.bf16.msra.mxu0 %v3135_v26  ;;  %v3173_v58 = vld [vmem:[#allocation2 + $0x1a4] ss:$16 sps:$4 sm:$0xff]   ;;  %v3177_v61 = vld [vmem:[#allocation2 + $0x1a0] ss:$16 sps:$4 sm:$0xff]  }
  0x42   :  { %1761 = vmatpush1.bf16.msra.mxu1 %v3136_v27  ;;  %1633 = vmatprep.subr.bf16.mxu0 %v3137_v28  ;;  %v3175_v59 = vld [vmem:[#allocation2 + $0x7a4] ss:$16 sps:$4 sm:$0xff]   ;;  %v3178_v62 = vld [vmem:[#allocation2 + $0x7a0] ss:$16 sps:$4 sm:$0xff]   ;;  %v3213_v27 = vld [vmem:[#allocation2 + $0x8c] ss:$16 sps:$4 sm:$0xff]  }
  0x43   :  { %1762 = vmatprep.subr.bf16.mxu1 %v3139_v29  ;;  %v328_v60 = vld [vmem:[#allocation2 + $0x7c0] sm:$0xff]  ;;  %v62_v3 = vld [vmem:[%s3915_s0 + $0x30] sm:$0xff]  ;;  %v3211_v29 = vld [vmem:[#allocation2 + $0x88] ss:$16 sps:$4 sm:$0xff]  }
  0x44   :  { %v3179_v63 = vld [vmem:[#allocation2 + $0x1c4] ss:$16 sps:$4 sm:$0xff]   ;;  %v2938_v0 = vcombine.high %v328_v60, %v328_v60  ;;  %v2937_v1 = vcombine.low %v328_v60, %v328_v60  ;;  %v3182_v2 = vld [vmem:[#allocation2 + $0x1c0] ss:$16 sps:$4 sm:$0xff]  }
  0x45   :  { %1634 = vmatpush1.bf16.msra.mxu0 %v3141_v30  ;;  %v70_v4 = vld [vmem:[%s3915_s0 + $0x70] sm:$0xff]  ;;  %v56_v11 = vld [vmem:[%s3915_s0] sm:$0xff] }
  0x46   :  { %1763 = vmatpush1.bf16.msra.mxu1 %v3142_v31  ;;  %1635 = vmatprep.subr.bf16.mxu0 %v3143_v32  ;;  %v1608_v5 = vsel %vm1606_vm1, %v2937_v1, 0  ;;  %v3184_v6 = vld [vmem:[#allocation2 + $0x1e4] ss:$16 sps:$4 sm:$0xff]   ;;  %v3189_v9 = vld [vmem:[#allocation2 + $0x1e0] ss:$16 sps:$4 sm:$0xff]   ;;  %v3753_v10 = vpack.c.bf16 %v70_v4, %v62_v3 }
  0x47   :  { %1764 = vmatprep.subr.bf16.mxu1 %v3145_v33  ;;  %v64_v12 = vld [vmem:[%s3915_s0 + $0x40] sm:$0xff]  ;;  %v3219_v31 = vld [vmem:[#allocation2 + $0xac] ss:$16 sps:$4 sm:$0xff]   ;;  %v3217_v33 = vld [vmem:[#allocation2 + $0xa8] ss:$16 sps:$4 sm:$0xff]  }
  0x48   :  { %v3192_v13 = vld [vmem:[#allocation2 + $0x204] ss:$16 sps:$4 sm:$0xff]   ;;  %v3190_v15 = vld [vmem:[#allocation2 + $0x200] ss:$16 sps:$4 sm:$0xff]   ;;  %v3762_v16 = vpack.c.bf16 %v64_v12, %v56_v11  ;;  %v3259_v1 = vld [vmem:[#allocation2 + $0x188] ss:$16 sps:$4 sm:$0xff]  }
  0x49   :  { %1636 = vmatpush1.bf16.msra.mxu0 %v3147_v34  ;;  %v3198_v18 = vld [vmem:[#allocation2 + $0x224] ss:$16 sps:$4 sm:$0xff]   ;;  %v3196_v20 = vld [vmem:[#allocation2 + $0x220] ss:$16 sps:$4 sm:$0xff]   ;;  %v3267_v3 = vld [vmem:[#allocation2 + $0x1ac] ss:$16 sps:$4 sm:$0xff]  }
  0x4a   :  { %1765 = vmatpush1.bf16.msra.mxu1 %v3148_v35  ;;  %1637 = vmatprep.subr.bf16.mxu0 %v3149_v36  ;;  %v3204_v22 = vld [vmem:[#allocation2 + $0x244] ss:$16 sps:$4 sm:$0xff]   ;;  %v3202_v24 = vld [vmem:[#allocation2 + $0x240] ss:$16 sps:$4 sm:$0xff]   ;;  %v3225_v35 = vld [vmem:[#allocation2 + $0xcc] ss:$16 sps:$4 sm:$0xff]  }
  0x4b   :  { %1766 = vmatprep.subr.bf16.mxu1 %v3151_v37  ;;  %v3210_v26 = vld [vmem:[#allocation2 + $0x264] ss:$16 sps:$4 sm:$0xff]   ;;  %v3208_v28 = vld [vmem:[#allocation2 + $0x260] ss:$16 sps:$4 sm:$0xff]   ;;  %v3223_v37 = vld [vmem:[#allocation2 + $0xc8] ss:$16 sps:$4 sm:$0xff]  }
  0x4c   :  { %v3216_v30 = vld [vmem:[#allocation2 + $0x284] ss:$16 sps:$4 sm:$0xff]   ;;  %v3214_v32 = vld [vmem:[#allocation2 + $0x280] ss:$16 sps:$4 sm:$0xff]   ;;  %v3279_v12 = vld [vmem:[#allocation2 + $0x1ec] ss:$16 sps:$4 sm:$0xff]  }
  0x4d   :  { %1638 = vmatpush1.bf16.msra.mxu0 %v3153_v38  ;;  %v3222_v34 = vld [vmem:[#allocation2 + $0x2a4] ss:$16 sps:$4 sm:$0xff]   ;;  %v3220_v36 = vld [vmem:[#allocation2 + $0x2a0] ss:$16 sps:$4 sm:$0xff]  }
  0x4e   :  { %1767 = vmatpush1.bf16.msra.mxu1 %v3154_v39  ;;  %1639 = vmatprep.subr.bf16.mxu0 %v3155_v40  ;;  %v3228_v38 = vld [vmem:[#allocation2 + $0x2c4] ss:$16 sps:$4 sm:$0xff]   ;;  %v3231_v39 = vld [vmem:[#allocation2 + $0xec] ss:$16 sps:$4 sm:$0xff]   ;;  %v3226_v40 = vld [vmem:[#allocation2 + $0x2c0] ss:$16 sps:$4 sm:$0xff]  }
  0x4f   :  { %1768 = vmatprep.subr.bf16.mxu1 %v3157_v41  ;;  %v59_v41 = vld [vmem:[%s3915_s0 + $0x18] sm:$0xff]  ;;  %v3234_v44 = vld [vmem:[#allocation2 + $0x2e4] ss:$16 sps:$4 sm:$0xff]   ;;  %v3250_v60 = vld [vmem:[#allocation2 + $0x340] ss:$16 sps:$4 sm:$0xff]  }
  0x50   :  { %v3240_v50 = vld [vmem:[#allocation2 + $0x304] ss:$16 sps:$4 sm:$0xff]   ;;  %v3262_v4 = vld [vmem:[#allocation2 + $0x380] ss:$16 sps:$4 sm:$0xff]  }
  0x51   :  { %1640 = vmatpush1.bf16.msra.mxu0 %v3159_v42  ;;  %v67_v42 = vld [vmem:[%s3915_s0 + $0x58] sm:$0xff]  ;;  %v3276_v11 = vld [vmem:[#allocation2 + $0x3c4] ss:$16 sps:$4 sm:$0xff]  }
  0x52   :  { %1769 = vmatpush1.bf16.msra.mxu1 %v3160_v45  ;;  %1641 = vmatprep.subr.bf16.mxu0 %v3161_v46  ;;  %v3771_v45 = vpack.c.bf16 %v67_v42, %v59_v41  ;;  %v3237_v46 = vld [vmem:[#allocation2 + $0x10c] ss:$16 sps:$4 sm:$0xff]   ;;  %v3312_v41 = vld [vmem:[#allocation2 + $0x484] ss:$16 sps:$4 sm:$0xff]  }
  0x53   :  { %1770 = vmatprep.subr.bf16.mxu1 %v3163_v48  ;;  %v3232_v48 = vld [vmem:[#allocation2 + $0x2e0] ss:$16 sps:$4 sm:$0xff]   ;;  %v3315_v42 = vld [vmem:[#allocation2 + $0x2ac] ss:$16 sps:$4 sm:$0xff]  }
  0x55   :  { %1642 = vmatpush1.bf16.msra.mxu0 %v3165_v49  ;;  %v3235_v49 = vld [vmem:[#allocation2 + $0x108] ss:$16 sps:$4 sm:$0xff]  }
  0x56   :  { %1771 = vmatpush1.bf16.msra.mxu1 %v3166_v52  ;;  %1643 = vmatprep.subr.bf16.mxu0 %v3167_v53  ;;  %v3238_v52 = vld [vmem:[#allocation2 + $0x300] ss:$16 sps:$4 sm:$0xff]   ;;  %v3241_v53 = vld [vmem:[#allocation2 + $0x128] ss:$16 sps:$4 sm:$0xff]  }
  0x57   :  { %1772 = vmatprep.subr.bf16.mxu1 %v3169_v55  ;;  %v3249_v55 = vld [vmem:[#allocation2 + $0x14c] ss:$16 sps:$4 sm:$0xff]  }
  0x59   :  { %1644 = vmatpush1.bf16.msra.mxu0 %v3171_v56  ;;  %v3244_v56 = vld [vmem:[#allocation2 + $0x320] ss:$16 sps:$4 sm:$0xff]  }
  0x5a   :  { %1773 = vmatpush1.bf16.msra.mxu1 %v3172_v57  ;;  %1645 = vmatprep.subr.bf16.mxu0 %v3173_v58  ;;  %v3247_v57 = vld [vmem:[#allocation2 + $0x148] ss:$16 sps:$4 sm:$0xff]   ;;  %v3252_v58 = vld [vmem:[#allocation2 + $0x344] ss:$16 sps:$4 sm:$0xff]  }
  0x5b   :  { %1774 = vmatprep.subr.bf16.mxu1 %v3175_v59  ;;  %v3255_v59 = vld [vmem:[#allocation2 + $0x16c] ss:$16 sps:$4 sm:$0xff]  }
  0x5d   :  { %1646 = vmatpush1.bf16.msra.mxu0 %v3177_v61  ;;  %v3253_v61 = vld [vmem:[#allocation2 + $0x168] ss:$16 sps:$4 sm:$0xff]  }
  0x5e   :  { %1775 = vmatpush1.bf16.msra.mxu1 %v3178_v62  ;;  %1647 = vmatprep.subr.bf16.mxu0 %v3179_v63  ;;  %v3258_v62 = vld [vmem:[#allocation2 + $0x364] ss:$16 sps:$4 sm:$0xff]   ;;  %v3261_v63 = vld [vmem:[#allocation2 + $0x18c] ss:$16 sps:$4 sm:$0xff]  }
  0x5f   :  { %2941 = vmatprep.subr.msk.bf16.mxu1 %vm1606_vm1, %v2938_v0  ;;  %v3256_v0 = vld [vmem:[#allocation2 + $0x360] ss:$16 sps:$4 sm:$0xff]  }
  0x61   :  { %1648 = vmatpush1.bf16.msra.mxu0 %v3182_v2  ;;  %v3264_v2 = vld [vmem:[#allocation2 + $0x384] ss:$16 sps:$4 sm:$0xff]  }
  0x62   :  { %1777 = vmatpush1.bf16.msra.mxu1 %v1608_v5  ;;  %1649 = vmatprep.subr.bf16.mxu0 %v3184_v6  ;;  %v3265_v5 = vld [vmem:[#allocation2 + $0x1a8] ss:$16 sps:$4 sm:$0xff]   ;;  %v3270_v6 = vld [vmem:[#allocation2 + $0x3a4] ss:$16 sps:$4 sm:$0xff]  }
  0x63   :  { %1791 = vmatprep.subr.bf16.mxu1 %v3188_v7  ;;  %v3273_v7 = vld [vmem:[#allocation2 + $0x1cc] ss:$16 sps:$4 sm:$0xff]  }
  0x65   :  { %1781 = vmatmul.mubr.bf16.vlgmr.msra.gmra.mrb[0].mxu1 %v3753_v10  ;;  %1650 = vmatpush1.bf16.msra.mxu0 %v3189_v9  ;;  %v3271_v9 = vld [vmem:[#allocation2 + $0x1c8] ss:$16 sps:$4 sm:$0xff]  }
  0x66   :  { %1792 = vmatpush1.bf16.msra.mxu1 %v3186_v8  ;;  %1662 = vmatprep.subr.bf16.mxu0 %v3192_v13  ;;  %v3268_v8 = vld [vmem:[#allocation2 + $0x3a0] ss:$16 sps:$4 sm:$0xff]  }
  0x67   :  { %1793 = vmatprep.subr.bf16.mxu1 %v3195_v14  ;;  %1823 = vmatprep.mubr.bf16.mxu1 %v73_v54  ;;  %v3246_v54 = vld [vmem:[#allocation2 + $0x324] ss:$16 sps:$4 sm:$0xff]   ;;  %v3274_v13 = vld [vmem:[#allocation2 + $0x3c0] ss:$16 sps:$4 sm:$0xff]   ;;  %v3277_v14 = vld [vmem:[#allocation2 + $0x1e8] ss:$16 sps:$4 sm:$0xff]  }
  0x68   :  { %1652 = vmatmul.mubr.bf16.vlgmr.msra.gmra.mrb[0].mxu0 %v3762_v16 }
  0x69   :  { %1663 = vmatpush1.bf16.msra.mxu0 %v3190_v15  ;;  %1694 = vmatprep.mubr.bf16.mxu0 %v3771_v45  ;;  %v3282_v15 = vld [vmem:[#allocation2 + $0x3e4] ss:$16 sps:$4 sm:$0xff]  }
  0x6a   :  { %1794 = vmatpush1.bf16.msra.mxu1 %v3193_v17  ;;  %1664 = vmatprep.subr.bf16.mxu0 %v3198_v18  ;;  %v3285_v17 = vld [vmem:[#allocation2 + $0x20c] ss:$16 sps:$4 sm:$0xff]   ;;  %v3280_v18 = vld [vmem:[#allocation2 + $0x3e0] ss:$16 sps:$4 sm:$0xff]  }
  0x6b   :  { %1795 = vmatprep.subr.bf16.mxu1 %v3201_v19  ;;  %v3283_v19 = vld [vmem:[#allocation2 + $0x208] ss:$16 sps:$4 sm:$0xff]  }
  0x6d   :  { %1665 = vmatpush1.bf16.msra.mxu0 %v3196_v20  ;;  %v58_v20 = vld [vmem:[%s3915_s0 + $0x10] sm:$0xff] }
  0x6e   :  { %1796 = vmatpush1.bf16.msra.mxu1 %v3199_v21  ;;  %1666 = vmatprep.subr.bf16.mxu0 %v3204_v22  ;;  %v66_v21 = vld [vmem:[%s3915_s0 + $0x50] sm:$0xff] }
  0x6f   :  { %1797 = vmatprep.subr.bf16.mxu1 %v3207_v23  ;;  %v3288_v22 = vld [vmem:[#allocation2 + $0x404] ss:$16 sps:$4 sm:$0xff]   ;;  %v3291_v23 = vld [vmem:[#allocation2 + $0x22c] ss:$16 sps:$4 sm:$0xff]  }
  0x71   :  { %1667 = vmatpush1.bf16.msra.mxu0 %v3202_v24  ;;  %v3286_v24 = vld [vmem:[#allocation2 + $0x400] ss:$16 sps:$4 sm:$0xff]  }
  0x72   :  { %1798 = vmatpush1.bf16.msra.mxu1 %v3205_v25  ;;  %1668 = vmatprep.subr.bf16.mxu0 %v3210_v26  ;;  %v3781_v25 = vpack.c.bf16 %v66_v21, %v58_v20  ;;  %v3289_v26 = vld [vmem:[#allocation2 + $0x228] ss:$16 sps:$4 sm:$0xff]   ;;  %v3372_v20 = vld [vmem:[#allocation2 + $0x5c4] ss:$16 sps:$4 sm:$0xff]   ;;  %v3375_v21 = vld [vmem:[#allocation2 + $0x3ec] ss:$16 sps:$4 sm:$0xff]  }
  0x73   :  { %1799 = vmatprep.subr.bf16.mxu1 %v3213_v27  ;;  %v3294_v27 = vld [vmem:[#allocation2 + $0x424] ss:$16 sps:$4 sm:$0xff]  }
  0x75   :  { %1669 = vmatpush1.bf16.msra.mxu0 %v3208_v28  ;;  %v3297_v28 = vld [vmem:[#allocation2 + $0x24c] ss:$16 sps:$4 sm:$0xff]  }
  0x76   :  { %1800 = vmatpush1.bf16.msra.mxu1 %v3211_v29  ;;  %1670 = vmatprep.subr.bf16.mxu0 %v3216_v30  ;;  %v3292_v29 = vld [vmem:[#allocation2 + $0x420] ss:$16 sps:$4 sm:$0xff]   ;;  %v61_v30 = vld [vmem:[%s3915_s0 + $0x28] sm:$0xff] }
  0x77   :  { %1801 = vmatprep.subr.bf16.mxu1 %v3219_v31  ;;  %v3295_v31 = vld [vmem:[#allocation2 + $0x248] ss:$16 sps:$4 sm:$0xff]  }
  0x79   :  { %1671 = vmatpush1.bf16.msra.mxu0 %v3214_v32 }
  0x7a   :  { %1802 = vmatpush1.bf16.msra.mxu1 %v3217_v33  ;;  %1672 = vmatprep.subr.bf16.mxu0 %v3222_v34  ;;  %v3300_v33 = vld [vmem:[#allocation2 + $0x444] ss:$16 sps:$4 sm:$0xff]   ;;  %v3303_v34 = vld [vmem:[#allocation2 + $0x26c] ss:$16 sps:$4 sm:$0xff]  }
  0x7b   :  { %1803 = vmatprep.subr.bf16.mxu1 %v3225_v35  ;;  %v3298_v35 = vld [vmem:[#allocation2 + $0x440] ss:$16 sps:$4 sm:$0xff]  }
  0x7d   :  { %1673 = vmatpush1.bf16.msra.mxu0 %v3220_v36  ;;  %v3301_v36 = vld [vmem:[#allocation2 + $0x268] ss:$16 sps:$4 sm:$0xff]  }
  0x7e   :  { %1804 = vmatpush1.bf16.msra.mxu1 %v3223_v37  ;;  %1674 = vmatprep.subr.bf16.mxu0 %v3228_v38  ;;  %v3306_v37 = vld [vmem:[#allocation2 + $0x464] ss:$16 sps:$4 sm:$0xff]   ;;  %v3309_v38 = vld [vmem:[#allocation2 + $0x28c] ss:$16 sps:$4 sm:$0xff]  }
  0x7f   :  { %1805 = vmatprep.subr.bf16.mxu1 %v3231_v39  ;;  %v3304_v39 = vld [vmem:[#allocation2 + $0x460] ss:$16 sps:$4 sm:$0xff]  }
  0x81   :  { %1675 = vmatpush1.bf16.msra.mxu0 %v3226_v40  ;;  %v3307_v40 = vld [vmem:[#allocation2 + $0x288] ss:$16 sps:$4 sm:$0xff]  }
  0x82   :  { %1806 = vmatpush1.bf16.msra.mxu1 %v3229_v43  ;;  %1676 = vmatprep.subr.bf16.mxu0 %v3234_v44  ;;  %v3310_v43 = vld [vmem:[#allocation2 + $0x480] ss:$16 sps:$4 sm:$0xff]   ;;  %v3313_v44 = vld [vmem:[#allocation2 + $0x2a8] ss:$16 sps:$4 sm:$0xff]  }
  0x83   :  { %1807 = vmatprep.subr.bf16.mxu1 %v3237_v46  ;;  %v3321_v46 = vld [vmem:[#allocation2 + $0x2cc] ss:$16 sps:$4 sm:$0xff]  }
  0x85   :  { %1677 = vmatpush1.bf16.msra.mxu0 %v3232_v48  ;;  %v3316_v48 = vld [vmem:[#allocation2 + $0x4a0] ss:$16 sps:$4 sm:$0xff]  }
  0x86   :  { %1808 = vmatpush1.bf16.msra.mxu1 %v3235_v49  ;;  %1678 = vmatprep.subr.bf16.mxu0 %v3240_v50  ;;  %v3319_v49 = vld [vmem:[#allocation2 + $0x2c8] ss:$16 sps:$4 sm:$0xff]   ;;  %v3324_v50 = vld [vmem:[#allocation2 + $0x4c4] ss:$16 sps:$4 sm:$0xff]  }
  0x87   :  { %1809 = vmatprep.subr.bf16.mxu1 %v3243_v51  ;;  %v3327_v51 = vld [vmem:[#allocation2 + $0x2ec] ss:$16 sps:$4 sm:$0xff]  }
  0x89   :  { %1679 = vmatpush1.bf16.msra.mxu0 %v3238_v52  ;;  %v3322_v52 = vld [vmem:[#allocation2 + $0x4c0] ss:$16 sps:$4 sm:$0xff]  }
  0x8a   :  { %1810 = vmatpush1.bf16.msra.mxu1 %v3241_v53  ;;  %1680 = vmatprep.subr.bf16.mxu0 %v3246_v54  ;;  %v3325_v53 = vld [vmem:[#allocation2 + $0x2e8] ss:$16 sps:$4 sm:$0xff]   ;;  %v3330_v54 = vld [vmem:[#allocation2 + $0x4e4] ss:$16 sps:$4 sm:$0xff]  }
  0x8b   :  { %1811 = vmatprep.subr.bf16.mxu1 %v3249_v55  ;;  %v3333_v55 = vld [vmem:[#allocation2 + $0x30c] ss:$16 sps:$4 sm:$0xff]  }
  0x8d   :  { %1681 = vmatpush1.bf16.msra.mxu0 %v3244_v56  ;;  %v3328_v56 = vld [vmem:[#allocation2 + $0x4e0] ss:$16 sps:$4 sm:$0xff]  }
  0x8e   :  { %1812 = vmatpush1.bf16.msra.mxu1 %v3247_v57  ;;  %1682 = vmatprep.subr.bf16.mxu0 %v3252_v58  ;;  %v3331_v57 = vld [vmem:[#allocation2 + $0x308] ss:$16 sps:$4 sm:$0xff]   ;;  %v3336_v58 = vld [vmem:[#allocation2 + $0x504] ss:$16 sps:$4 sm:$0xff]  }
  0x8f   :  { %1813 = vmatprep.subr.bf16.mxu1 %v3255_v59  ;;  %v3339_v59 = vld [vmem:[#allocation2 + $0x32c] ss:$16 sps:$4 sm:$0xff]  }
  0x91   :  { %1683 = vmatpush1.bf16.msra.mxu0 %v3250_v60  ;;  %v3334_v60 = vld [vmem:[#allocation2 + $0x500] ss:$16 sps:$4 sm:$0xff]  }
  0x92   :  { %1814 = vmatpush1.bf16.msra.mxu1 %v3253_v61  ;;  %1684 = vmatprep.subr.bf16.mxu0 %v3258_v62  ;;  %v3337_v61 = vld [vmem:[#allocation2 + $0x328] ss:$16 sps:$4 sm:$0xff]   ;;  %v3342_v62 = vld [vmem:[#allocation2 + $0x524] ss:$16 sps:$4 sm:$0xff]  }
  0x93   :  { %1815 = vmatprep.subr.bf16.mxu1 %v3261_v63  ;;  %v3345_v63 = vld [vmem:[#allocation2 + $0x34c] ss:$16 sps:$4 sm:$0xff]  }
  0x95   :  { %1685 = vmatpush1.bf16.msra.mxu0 %v3256_v0  ;;  %v3340_v0 = vld [vmem:[#allocation2 + $0x520] ss:$16 sps:$4 sm:$0xff]  }
  0x96   :  { %1816 = vmatpush1.bf16.msra.mxu1 %v3259_v1  ;;  %1686 = vmatprep.subr.bf16.mxu0 %v3264_v2  ;;  %v3343_v1 = vld [vmem:[#allocation2 + $0x348] ss:$16 sps:$4 sm:$0xff]   ;;  %v3348_v2 = vld [vmem:[#allocation2 + $0x544] ss:$16 sps:$4 sm:$0xff]  }
  0x97   :  { %1817 = vmatprep.subr.bf16.mxu1 %v3267_v3  ;;  %v3351_v3 = vld [vmem:[#allocation2 + $0x36c] ss:$16 sps:$4 sm:$0xff]  }
  0x99   :  { %1687 = vmatpush1.bf16.msra.mxu0 %v3262_v4  ;;  %v3346_v4 = vld [vmem:[#allocation2 + $0x540] ss:$16 sps:$4 sm:$0xff]  }
  0x9a   :  { %1818 = vmatpush1.bf16.msra.mxu1 %v3265_v5  ;;  %1688 = vmatprep.subr.bf16.mxu0 %v3270_v6  ;;  %v3349_v5 = vld [vmem:[#allocation2 + $0x368] ss:$16 sps:$4 sm:$0xff]   ;;  %v3354_v6 = vld [vmem:[#allocation2 + $0x564] ss:$16 sps:$4 sm:$0xff]  }
  0x9b   :  { %1819 = vmatprep.subr.bf16.mxu1 %v3273_v7  ;;  %v3357_v7 = vld [vmem:[#allocation2 + $0x38c] ss:$16 sps:$4 sm:$0xff]  }
  0x9d   :  { %1689 = vmatpush1.bf16.msra.mxu0 %v3268_v8  ;;  %v3352_v8 = vld [vmem:[#allocation2 + $0x560] ss:$16 sps:$4 sm:$0xff]  }
  0x9e   :  { %1820 = vmatpush1.bf16.msra.mxu1 %v3271_v9  ;;  %1690 = vmatprep.subr.bf16.mxu0 %v3276_v11  ;;  %v3355_v9 = vld [vmem:[#allocation2 + $0x388] ss:$16 sps:$4 sm:$0xff]   ;;  %v3360_v11 = vld [vmem:[#allocation2 + $0x584] ss:$16 sps:$4 sm:$0xff]  }
  0x9f   :  { %1821 = vmatprep.subr.bf16.mxu1 %v3279_v12  ;;  %v3363_v12 = vld [vmem:[#allocation2 + $0x3ac] ss:$16 sps:$4 sm:$0xff]  }
  0xa1   :  { %1691 = vmatpush1.bf16.msra.mxu0 %v3274_v13  ;;  %v3358_v13 = vld [vmem:[#allocation2 + $0x580] ss:$16 sps:$4 sm:$0xff]  }
  0xa2   :  { %1822 = vmatpush1.bf16.msra.mxu1 %v3277_v14  ;;  %1692 = vmatprep.subr.bf16.mxu0 %v3282_v15  ;;  %v3361_v14 = vld [vmem:[#allocation2 + $0x3a8] ss:$16 sps:$4 sm:$0xff]   ;;  %v3366_v15 = vld [vmem:[#allocation2 + $0x5a4] ss:$16 sps:$4 sm:$0xff]  }
  0xa3   :  { %1834 = vmatprep.subr.bf16.mxu1 %v3285_v17  ;;  %v3369_v17 = vld [vmem:[#allocation2 + $0x3cc] ss:$16 sps:$4 sm:$0xff]  }
  0xa5   :  { %1824 = vmatmul.mubr.bf16.vlgmr.msra.gmra.mrb[4].mxu1 %v3762_v16  ;;  %1693 = vmatpush1.bf16.msra.mxu0 %v3280_v18  ;;  %v69_v16 = vld [vmem:[%s3915_s0 + $0x68] sm:$0xff]  ;;  %v3364_v18 = vld [vmem:[#allocation2 + $0x5a0] ss:$16 sps:$4 sm:$0xff]  }
  0xa6   :  { %1835 = vmatpush1.bf16.msra.mxu1 %v3283_v19  ;;  %1705 = vmatprep.subr.bf16.mxu0 %v3288_v22  ;;  %v3791_v32 = vpack.c.bf16 %v69_v16, %v61_v30  ;;  %v3367_v19 = vld [vmem:[#allocation2 + $0x3c8] ss:$16 sps:$4 sm:$0xff]   ;;  %v3370_v22 = vld [vmem:[#allocation2 + $0x5c0] ss:$16 sps:$4 sm:$0xff]   ;;  %v3384_v16 = vld [vmem:[#allocation2 + $0x42c] ss:$16 sps:$4 sm:$0xff]  }
  0xa7   :  { %1836 = vmatprep.subr.bf16.mxu1 %v3291_v23  ;;  %1866 = vmatprep.mubr.bf16.mxu1 %v3771_v45  ;;  %v3318_v45 = vld [vmem:[#allocation2 + $0x4a4] ss:$16 sps:$4 sm:$0xff]   ;;  %v3373_v23 = vld [vmem:[#allocation2 + $0x3e8] ss:$16 sps:$4 sm:$0xff]  }
  0xa8   :  { %1695 = vmatmul.mubr.bf16.vlgmr.msra.gmra.mrb[0].mxu0 %v3781_v25  ;;  %v68_v30 = vld [vmem:[%s3915_s0 + $0x60] sm:$0xff] }
  0xa9   :  { %1706 = vmatpush1.bf16.msra.mxu0 %v3286_v24  ;;  %1737 = vmatprep.mubr.bf16.mxu0 %v3791_v32  ;;  %v3378_v24 = vld [vmem:[#allocation2 + $0x5e4] ss:$16 sps:$4 sm:$0xff]  }
  0xaa   :  { %1837 = vmatpush1.bf16.msra.mxu1 %v3289_v26  ;;  %1707 = vmatprep.subr.bf16.mxu0 %v3294_v27  ;;  %v3381_v26 = vld [vmem:[#allocation2 + $0x40c] ss:$16 sps:$4 sm:$0xff]   ;;  %v3376_v27 = vld [vmem:[#allocation2 + $0x5e0] ss:$16 sps:$4 sm:$0xff]  }
  0xab   :  { %1838 = vmatprep.subr.bf16.mxu1 %v3297_v28  ;;  %v3379_v28 = vld [vmem:[#allocation2 + $0x408] ss:$16 sps:$4 sm:$0xff]  }
  0xad   :  { %1708 = vmatpush1.bf16.msra.mxu0 %v3292_v29  ;;  %v60_v29 = vld [vmem:[%s3915_s0 + $0x20] sm:$0xff] }
  0xae   :  { %1839 = vmatpush1.bf16.msra.mxu1 %v3295_v31  ;;  %1709 = vmatprep.subr.bf16.mxu0 %v3300_v33  ;;  %v3473_v31 = vld [vmem:[#allocation5 + $0x4] ss:$8 sps:$4 sm:$0xff]   ;;  %v3801_v33 = vpack.c.bf16 %v68_v30, %v60_v29  ;;  %v3430_v29 = vld [vmem:[#allocation2 + $0x628] ss:$16 sps:$4 sm:$0xff]  }
  0xaf   :  { %1840 = vmatprep.subr.bf16.mxu1 %v3303_v34  ;;  %v3382_v34 = vld [vmem:[#allocation2 + $0x428] ss:$16 sps:$4 sm:$0xff]   ;;  %v3435_v30 = vld [vmem:[#allocation2 + $0x64c] ss:$16 sps:$4 sm:$0xff]  }
  0xb1   :  { %1710 = vmatpush1.bf16.msra.mxu0 %v3298_v35  ;;  %v3471_v35 = vld [vmem:[#allocation5] ss:$8 sps:$4 sm:$0xff]  }
  0xb2   :  { %1841 = vmatpush1.bf16.msra.mxu1 %v3301_v36  ;;  %1711 = vmatprep.subr.bf16.mxu0 %v3306_v37  ;;  %v3387_v36 = vld [vmem:[#allocation2 + $0x44c] ss:$16 sps:$4 sm:$0xff]  }
  0xb3   :  { %1842 = vmatprep.subr.bf16.mxu1 %v3309_v38  ;;  %v3476_v37 = vld [vmem:[#allocation5 + $0x14] ss:$8 sps:$4 sm:$0xff]   ;;  %v3385_v38 = vld [vmem:[#allocation2 + $0x448] ss:$16 sps:$4 sm:$0xff]  }
  0xb5   :  { %1712 = vmatpush1.bf16.msra.mxu0 %v3304_v39  ;;  %v3390_v39 = vld [vmem:[#allocation2 + $0x46c] ss:$16 sps:$4 sm:$0xff]  }
  0xb6   :  { %1843 = vmatpush1.bf16.msra.mxu1 %v3307_v40  ;;  %1713 = vmatprep.subr.bf16.mxu0 %v3312_v41  ;;  %v3474_v40 = vld [vmem:[#allocation5 + $0x10] ss:$8 sps:$4 sm:$0xff]   ;;  %v3479_v41 = vld [vmem:[#allocation5 + $0x24] ss:$8 sps:$4 sm:$0xff]  }
  0xb7   :  { %1844 = vmatprep.subr.bf16.mxu1 %v3315_v42  ;;  %v3477_v42 = vld [vmem:[#allocation5 + $0x20] ss:$8 sps:$4 sm:$0xff]  }
  0xb9   :  { %1714 = vmatpush1.bf16.msra.mxu0 %v3310_v43  ;;  %v3393_v43 = vld [vmem:[#allocation2 + $0x48c] ss:$16 sps:$4 sm:$0xff]  }
  0xba   :  { %1845 = vmatpush1.bf16.msra.mxu1 %v3313_v44  ;;  %1715 = vmatprep.subr.bf16.mxu0 %v3318_v45  ;;  %v3482_v44 = vld [vmem:[#allocation5 + $0x34] ss:$8 sps:$4 sm:$0xff]   ;;  %v3480_v45 = vld [vmem:[#allocation5 + $0x30] ss:$8 sps:$4 sm:$0xff]  }
  0xbb   :  { %1846 = vmatprep.subr.bf16.mxu1 %v3321_v46  ;;  %v3396_v46 = vld [vmem:[#allocation2 + $0x4ac] ss:$16 sps:$4 sm:$0xff]  }
  0xbd   :  { %1716 = vmatpush1.bf16.msra.mxu0 %v3316_v48  ;;  %v3485_v48 = vld [vmem:[#allocation5 + $0x44] ss:$8 sps:$4 sm:$0xff]  }
  0xbe   :  { %1847 = vmatpush1.bf16.msra.mxu1 %v3319_v49  ;;  %1717 = vmatprep.subr.bf16.mxu0 %v3324_v50  ;;  %v3394_v49 = vld [vmem:[#allocation2 + $0x4a8] ss:$16 sps:$4 sm:$0xff]  }
  0xbf   :  { %1848 = vmatprep.subr.bf16.mxu1 %v3327_v51  ;;  %v3483_v50 = vld [vmem:[#allocation5 + $0x40] ss:$8 sps:$4 sm:$0xff]   ;;  %v3399_v51 = vld [vmem:[#allocation2 + $0x4cc] ss:$16 sps:$4 sm:$0xff]  }
  0xc1   :  { %1718 = vmatpush1.bf16.msra.mxu0 %v3322_v52  ;;  %v3488_v52 = vld [vmem:[#allocation5 + $0x54] ss:$8 sps:$4 sm:$0xff]  }
  0xc2   :  { %1849 = vmatpush1.bf16.msra.mxu1 %v3325_v53  ;;  %1719 = vmatprep.subr.bf16.mxu0 %v3330_v54  ;;  %v3397_v53 = vld [vmem:[#allocation2 + $0x4c8] ss:$16 sps:$4 sm:$0xff]  }
  0xc3   :  { %1850 = vmatprep.subr.bf16.mxu1 %v3333_v55  ;;  %v3486_v54 = vld [vmem:[#allocation5 + $0x50] ss:$8 sps:$4 sm:$0xff]   ;;  %v3402_v55 = vld [vmem:[#allocation2 + $0x4ec] ss:$16 sps:$4 sm:$0xff]  }
  0xc5   :  { %1720 = vmatpush1.bf16.msra.mxu0 %v3328_v56  ;;  %v3491_v56 = vld [vmem:[#allocation5 + $0x64] ss:$8 sps:$4 sm:$0xff]  }
  0xc6   :  { %1851 = vmatpush1.bf16.msra.mxu1 %v3331_v57  ;;  %1721 = vmatprep.subr.bf16.mxu0 %v3336_v58  ;;  %v3400_v57 = vld [vmem:[#allocation2 + $0x4e8] ss:$16 sps:$4 sm:$0xff]  }
  0xc7   :  { %1852 = vmatprep.subr.bf16.mxu1 %v3339_v59  ;;  %v3489_v58 = vld [vmem:[#allocation5 + $0x60] ss:$8 sps:$4 sm:$0xff]   ;;  %v3405_v59 = vld [vmem:[#allocation2 + $0x50c] ss:$16 sps:$4 sm:$0xff]  }
  0xc9   :  { %1722 = vmatpush1.bf16.msra.mxu0 %v3334_v60  ;;  %v3494_v60 = vld [vmem:[#allocation5 + $0x74] ss:$8 sps:$4 sm:$0xff]  }
  0xca   :  { %1853 = vmatpush1.bf16.msra.mxu1 %v3337_v61  ;;  %1723 = vmatprep.subr.bf16.mxu0 %v3342_v62  ;;  %v3403_v61 = vld [vmem:[#allocation2 + $0x508] ss:$16 sps:$4 sm:$0xff]  }
  0xcb   :  { %1854 = vmatprep.subr.bf16.mxu1 %v3345_v63  ;;  %v3492_v62 = vld [vmem:[#allocation5 + $0x70] ss:$8 sps:$4 sm:$0xff]   ;;  %v3408_v63 = vld [vmem:[#allocation2 + $0x52c] ss:$16 sps:$4 sm:$0xff]  }
  0xcd   :  { %1724 = vmatpush1.bf16.msra.mxu0 %v3340_v0  ;;  %v3497_v0 = vld [vmem:[#allocation5 + $0x84] ss:$8 sps:$4 sm:$0xff]  }
  0xce   :  { %1855 = vmatpush1.bf16.msra.mxu1 %v3343_v1  ;;  %1725 = vmatprep.subr.bf16.mxu0 %v3348_v2  ;;  %v3406_v1 = vld [vmem:[#allocation2 + $0x528] ss:$16 sps:$4 sm:$0xff]  }
  0xcf   :  { %1856 = vmatprep.subr.bf16.mxu1 %v3351_v3  ;;  %v3495_v2 = vld [vmem:[#allocation5 + $0x80] ss:$8 sps:$4 sm:$0xff]   ;;  %v3411_v3 = vld [vmem:[#allocation2 + $0x54c] ss:$16 sps:$4 sm:$0xff]  }
  0xd1   :  { %1726 = vmatpush1.bf16.msra.mxu0 %v3346_v4  ;;  %v3500_v4 = vld [vmem:[#allocation5 + $0x94] ss:$8 sps:$4 sm:$0xff]  }
  0xd2   :  { %1857 = vmatpush1.bf16.msra.mxu1 %v3349_v5  ;;  %1727 = vmatprep.subr.bf16.mxu0 %v3354_v6  ;;  %v3409_v5 = vld [vmem:[#allocation2 + $0x548] ss:$16 sps:$4 sm:$0xff]  }
  0xd3   :  { %1858 = vmatprep.subr.bf16.mxu1 %v3357_v7  ;;  %v3498_v6 = vld [vmem:[#allocation5 + $0x90] ss:$8 sps:$4 sm:$0xff]   ;;  %v3414_v7 = vld [vmem:[#allocation2 + $0x56c] ss:$16 sps:$4 sm:$0xff]  }
  0xd5   :  { %1728 = vmatpush1.bf16.msra.mxu0 %v3352_v8  ;;  %v3503_v8 = vld [vmem:[#allocation5 + $0xa4] ss:$8 sps:$4 sm:$0xff]  }
  0xd6   :  { %1859 = vmatpush1.bf16.msra.mxu1 %v3355_v9  ;;  %1729 = vmatprep.subr.bf16.mxu0 %v3360_v11  ;;  %v3412_v9 = vld [vmem:[#allocation2 + $0x568] ss:$16 sps:$4 sm:$0xff]  }
  0xd7   :  { %1860 = vmatprep.subr.bf16.mxu1 %v3363_v12  ;;  %v3501_v11 = vld [vmem:[#allocation5 + $0xa0] ss:$8 sps:$4 sm:$0xff]   ;;  %v3417_v12 = vld [vmem:[#allocation2 + $0x58c] ss:$16 sps:$4 sm:$0xff]  }
  0xd9   :  { %1730 = vmatpush1.bf16.msra.mxu0 %v3358_v13  ;;  %v3506_v13 = vld [vmem:[#allocation5 + $0xb4] ss:$8 sps:$4 sm:$0xff]  }
  0xda   :  { %1861 = vmatpush1.bf16.msra.mxu1 %v3361_v14  ;;  %1731 = vmatprep.subr.bf16.mxu0 %v3366_v15  ;;  %v3415_v14 = vld [vmem:[#allocation2 + $0x588] ss:$16 sps:$4 sm:$0xff]  }
  0xdb   :  { %1862 = vmatprep.subr.bf16.mxu1 %v3369_v17  ;;  %v3504_v15 = vld [vmem:[#allocation5 + $0xb0] ss:$8 sps:$4 sm:$0xff]   ;;  %v3420_v17 = vld [vmem:[#allocation2 + $0x5ac] ss:$16 sps:$4 sm:$0xff]  }
  0xdd   :  { %1732 = vmatpush1.bf16.msra.mxu0 %v3364_v18  ;;  %v3509_v18 = vld [vmem:[#allocation5 + $0xc4] ss:$8 sps:$4 sm:$0xff]  }
  0xde   :  { %1863 = vmatpush1.bf16.msra.mxu1 %v3367_v19  ;;  %1733 = vmatprep.subr.bf16.mxu0 %v3372_v20  ;;  %v3418_v19 = vld [vmem:[#allocation2 + $0x5a8] ss:$16 sps:$4 sm:$0xff]  }
  0xdf   :  { %1864 = vmatprep.subr.bf16.mxu1 %v3375_v21  ;;  %v3507_v20 = vld [vmem:[#allocation5 + $0xc0] ss:$8 sps:$4 sm:$0xff]   ;;  %v3423_v21 = vld [vmem:[#allocation2 + $0x5cc] ss:$16 sps:$4 sm:$0xff]  }
  0xe1   :  { %1734 = vmatpush1.bf16.msra.mxu0 %v3370_v22  ;;  %v3421_v22 = vld [vmem:[#allocation2 + $0x5c8] ss:$16 sps:$4 sm:$0xff]  }
  0xe2   :  { %1865 = vmatpush1.bf16.msra.mxu1 %v3373_v23  ;;  %1735 = vmatprep.subr.bf16.mxu0 %v3378_v24  ;;  %v3426_v23 = vld [vmem:[#allocation2 + $0x5ec] ss:$16 sps:$4 sm:$0xff]   ;;  %v3424_v24 = vld [vmem:[#allocation2 + $0x5e8] ss:$16 sps:$4 sm:$0xff]  }
  0xe3   :  { %1877 = vmatprep.subr.bf16.mxu1 %v3381_v26  ;;  %v3429_v26 = vld [vmem:[#allocation2 + $0x60c] ss:$16 sps:$4 sm:$0xff]  }
  0xe5   :  { %1867 = vmatmul.mubr.bf16.vlgmr.msra.gmra.mrb[4].mxu1 %v3781_v25  ;;  %1736 = vmatpush1.bf16.msra.mxu0 %v3376_v27  ;;  %v3388_v25 = vld [vmem:[#allocation2 + $0x468] ss:$16 sps:$4 sm:$0xff]  }
  0xe6   :  { %1878 = vmatpush1.bf16.msra.mxu1 %v3379_v28  ;;  %1909 = vmatprep.mubr.bf16.mxu1 %v3791_v32  ;;  %v3391_v32 = vld [vmem:[#allocation2 + $0x488] ss:$16 sps:$4 sm:$0xff]   ;;  %v3432_v28 = vld [vmem:[#allocation2 + $0x62c] ss:$16 sps:$4 sm:$0xff]  }
  0xe7   :  { %1879 = vmatprep.subr.bf16.mxu1 %v3384_v16  ;;  %2387 = vmatprep.subr.bf16.mxu0 %v3473_v31  ;;  %v3427_v27 = vld [vmem:[#allocation2 + $0x608] ss:$16 sps:$4 sm:$0xff]   ;;  %v3438_v31 = vld [vmem:[#allocation2 + $0x66c] ss:$16 sps:$4 sm:$0xff]  }
  0xe8   :  { %1738 = vmatmul.mubr.bf16.vlgmr.msra.gmra.mrb[0].mxu0 %v3801_v33  ;;  %v3433_v16 = vld [vmem:[#allocation2 + $0x648] ss:$16 sps:$4 sm:$0xff]  }
  0xe9   :  { %2388 = vmatpush1.bf16.msra.mxu0 %v3471_v35  ;;  %v3441_v35 = vld [vmem:[#allocation2 + $0x68c] ss:$16 sps:$4 sm:$0xff]  }
  0xea   :  { %1880 = vmatpush1.bf16.msra.mxu1 %v3382_v34  ;;  %2389 = vmatprep.subr.bf16.mxu0 %v3476_v37  ;;  %v3436_v34 = vld [vmem:[#allocation2 + $0x668] ss:$16 sps:$4 sm:$0xff]   ;;  %v3444_v37 = vld [vmem:[#allocation2 + $0x6ac] ss:$16 sps:$4 sm:$0xff]  }
  0xeb   :  { %1881 = vmatprep.subr.bf16.mxu1 %v3387_v36  ;;  %v3439_v36 = vld [vmem:[#allocation2 + $0x688] ss:$16 sps:$4 sm:$0xff]  }
  0xed   :  { %2390 = vmatpush1.bf16.msra.mxu0 %v3474_v40 }
  0xee   :  { %1882 = vmatpush1.bf16.msra.mxu1 %v3385_v38  ;;  %2391 = vmatprep.subr.bf16.mxu0 %v3479_v41  ;;  %v3447_v38 = vld [vmem:[#allocation2 + $0x6cc] ss:$16 sps:$4 sm:$0xff]   ;;  %v3445_v41 = vld [vmem:[#allocation2 + $0x6c8] ss:$16 sps:$4 sm:$0xff]  }
  0xef   :  { %1883 = vmatprep.subr.bf16.mxu1 %v3390_v39 }
  0xf1   :  { %2392 = vmatpush1.bf16.msra.mxu0 %v3477_v42  ;;  %v3450_v42 = vld [vmem:[#allocation2 + $0x6ec] ss:$16 sps:$4 sm:$0xff]  }
  0xf2   :  { %1884 = vmatpush1.bf16.msra.mxu1 %v3388_v25  ;;  %2393 = vmatprep.subr.bf16.mxu0 %v3482_v44  ;;  %v3510_v44 = vld [vmem:[#allocation5 + $0xd0] ss:$8 sps:$4 sm:$0xff]  }
  0xf3   :  { %1885 = vmatprep.subr.bf16.mxu1 %v3393_v43  ;;  %v3512_v43 = vld [vmem:[#allocation5 + $0xd4] ss:$8 sps:$4 sm:$0xff]  }
  0xf5   :  { %2394 = vmatpush1.bf16.msra.mxu0 %v3480_v45  ;;  %v3453_v45 = vld [vmem:[#allocation2 + $0x70c] ss:$16 sps:$4 sm:$0xff]  }
  0xf6   :  { %1886 = vmatpush1.bf16.msra.mxu1 %v3391_v32  ;;  %2395 = vmatprep.subr.bf16.mxu0 %v3485_v48  ;;  %v3448_v32 = vld [vmem:[#allocation2 + $0x6e8] ss:$16 sps:$4 sm:$0xff]  }
  0xf7   :  { %1887 = vmatprep.subr.bf16.mxu1 %v3396_v46  ;;  %v3515_v46 = vld [vmem:[#allocation5 + $0xe4] ss:$8 sps:$4 sm:$0xff]   ;;  %v3513_v48 = vld [vmem:[#allocation5 + $0xe0] ss:$8 sps:$4 sm:$0xff]  }
  0xf9   :  { %2396 = vmatpush1.bf16.msra.mxu0 %v3483_v50  ;;  %v3456_v50 = vld [vmem:[#allocation2 + $0x72c] ss:$16 sps:$4 sm:$0xff]  }
  0xfa   :  { %1888 = vmatpush1.bf16.msra.mxu1 %v3394_v49  ;;  %2397 = vmatprep.subr.bf16.mxu0 %v3488_v52  ;;  %v3451_v49 = vld [vmem:[#allocation2 + $0x708] ss:$16 sps:$4 sm:$0xff]  }
  0xfb   :  { %1889 = vmatprep.subr.bf16.mxu1 %v3399_v51  ;;  %v3518_v51 = vld [vmem:[#allocation5 + $0xf4] ss:$8 sps:$4 sm:$0xff]   ;;  %v3516_v52 = vld [vmem:[#allocation5 + $0xf0] ss:$8 sps:$4 sm:$0xff]  }
  0xfd   :  { %2398 = vmatpush1.bf16.msra.mxu0 %v3486_v54  ;;  %v3459_v54 = vld [vmem:[#allocation2 + $0x74c] ss:$16 sps:$4 sm:$0xff]  }
  0xfe   :  { %1890 = vmatpush1.bf16.msra.mxu1 %v3397_v53  ;;  %2399 = vmatprep.subr.bf16.mxu0 %v3491_v56  ;;  %v3454_v53 = vld [vmem:[#allocation2 + $0x728] ss:$16 sps:$4 sm:$0xff]   ;;  %v3521_v56 = vld [vmem:[#allocation5 + $0x104] ss:$8 sps:$4 sm:$0xff]  }
  0xff   :  { %1891 = vmatprep.subr.bf16.mxu1 %v3402_v55  ;;  %v3457_v55 = vld [vmem:[#allocation2 + $0x748] ss:$16 sps:$4 sm:$0xff]  }
 0x101   :  { %2400 = vmatpush1.bf16.msra.mxu0 %v3489_v58  ;;  %v3460_v58 = vld [vmem:[#allocation2 + $0x768] ss:$16 sps:$4 sm:$0xff]  }
 0x102   :  { %1892 = vmatpush1.bf16.msra.mxu1 %v3400_v57  ;;  %2401 = vmatprep.subr.bf16.mxu0 %v3494_v60  ;;  %v3462_v57 = vld [vmem:[#allocation2 + $0x76c] ss:$16 sps:$4 sm:$0xff]   ;;  %v3463_v60 = vld [vmem:[#allocation2 + $0x788] ss:$16 sps:$4 sm:$0xff]  }
 0x103   :  { %1893 = vmatprep.subr.bf16.mxu1 %v3405_v59  ;;  %v3465_v59 = vld [vmem:[#allocation2 + $0x78c] ss:$16 sps:$4 sm:$0xff]  }
 0x105   :  { %2402 = vmatpush1.bf16.msra.mxu0 %v3492_v62  ;;  %v329_v62 = vld [vmem:[#allocation2 + $0x7c8] sm:$0xff] }
 0x106   :  { %1894 = vmatpush1.bf16.msra.mxu1 %v3403_v61  ;;  %2403 = vmatprep.subr.bf16.mxu0 %v3497_v0  ;;  %v3468_v61 = vld [vmem:[#allocation2 + $0x7ac] ss:$16 sps:$4 sm:$0xff]   ;;  %v2940_v0 = vcombine.high %v329_v62, %v329_v62 }
 0x107   :  { %1895 = vmatprep.subr.bf16.mxu1 %v3408_v63  ;;  %v3466_v63 = vld [vmem:[#allocation2 + $0x7a8] ss:$16 sps:$4 sm:$0xff]  }
 0x109   :  { %2404 = vmatpush1.bf16.msra.mxu0 %v3495_v2 }
 0x10a   :  { %1896 = vmatpush1.bf16.msra.mxu1 %v3406_v1  ;;  %2405 = vmatprep.subr.bf16.mxu0 %v3500_v4  ;;  %v2939_v1 = vcombine.low %v329_v62, %v329_v62  ;;  %v3549_v62 = vld [vmem:[#allocation5 + $0x1a0] ss:$8 sps:$4 sm:$0xff]  }
 0x10b   :  { %1897 = vmatprep.subr.bf16.mxu1 %v3411_v3  ;;  %v332_v3 = vlaneseq }
 0x10c   :  { %v1614_v2 = vsel %vm1606_vm1, %v2939_v1, 0  ;;  %v3557_v1 = vld [vmem:[#allocation5 + $0x1c4] ss:$8 sps:$4 sm:$0xff]  }
 0x10d   :  { %2406 = vmatpush1.bf16.msra.mxu0 %v3498_v6  ;;  %v3819_v4 = vshrl.u32 %v332_v3, 7  ;;  %v3825_v6 = vld [vmem:[%s3917_s2] sm:$0xf]  ;;  %v3560_v3 = vld [vmem:[#allocation5 + $0x1d4] ss:$8 sps:$4 sm:$0xff]  }
 0x10e   :  { %1898 = vmatpush1.bf16.msra.mxu1 %v3409_v5  ;;  %2407 = vmatprep.subr.bf16.mxu0 %v3503_v8 }
 0x10f   :  { %1899 = vmatprep.subr.bf16.mxu1 %v3414_v7  ;;  %v334_v5 = vsub.s32 0, %v3819_v4  ;;  %v338_v7 = vsub.s32 1, %v3819_v4 }
 0x111   :  { %2408 = vmatpush1.bf16.msra.mxu0 %v3501_v11  ;;  %v335_v8 = vrot.slane %v3825_v6, %v334_v5 }
 0x112   :  { %1900 = vmatpush1.bf16.msra.mxu1 %v3412_v9  ;;  %2409 = vmatprep.subr.bf16.mxu0 %v3506_v13 }
 0x113   :  { %1901 = vmatprep.subr.bf16.mxu1 %v3417_v12 }
 0x115   :  { %2410 = vmatpush1.bf16.msra.mxu0 %v3504_v15 }
 0x116   :  { %1902 = vmatpush1.bf16.msra.mxu1 %v3415_v14  ;;  %2411 = vmatprep.subr.bf16.mxu0 %v3509_v18 }
 0x117   :  { %1903 = vmatprep.subr.bf16.mxu1 %v3420_v17 }
 0x119   :  { %2412 = vmatpush1.bf16.msra.mxu0 %v3507_v20 }
 0x11a   :  { %1904 = vmatpush1.bf16.msra.mxu1 %v3418_v19  ;;  %2413 = vmatprep.subr.bf16.mxu0 %v3512_v43  ;;  %v3527_v43 = vld [vmem:[#allocation5 + $0x124] ss:$8 sps:$4 sm:$0xff]  }
 0x11b   :  { %1905 = vmatprep.subr.bf16.mxu1 %v3423_v21  ;;  %v3567_v21 = vld [vmem:[%s3920_s5 + $0x40] sm:$0xff]  }
 0x11d   :  { %2414 = vmatpush1.bf16.msra.mxu0 %v3510_v44  ;;  %v3575_v44 = vld [vmem:[%s3920_s5 + $0x60] sm:$0xff]  }
 0x11e   :  { %1906 = vmatpush1.bf16.msra.mxu1 %v3421_v22  ;;  %2415 = vmatprep.subr.bf16.mxu0 %v3515_v46  ;;  %v3568_v22 = vld [vmem:[%s3920_s5] sm:$0xff]  }
 0x11f   :  { %1907 = vmatprep.subr.bf16.mxu1 %v3426_v23  ;;  %v3569_v23 = vld [vmem:[%s3920_s5 + $0x48] sm:$0xff]  }
 0x120   :  { %v3530_v46 = vld [vmem:[#allocation5 + $0x134] ss:$8 sps:$4 sm:$0xff]  }
 0x121   :  { %2416 = vmatpush1.bf16.msra.mxu0 %v3513_v48  ;;  %v3528_v48 = vld [vmem:[#allocation5 + $0x130] ss:$8 sps:$4 sm:$0xff]  }
 0x122   :  { %1908 = vmatpush1.bf16.msra.mxu1 %v3424_v24  ;;  %2417 = vmatprep.subr.bf16.mxu0 %v3518_v51  ;;  %v3536_v51 = vld [vmem:[#allocation5 + $0x154] ss:$8 sps:$4 sm:$0xff]  }
 0x123   :  { %1920 = vmatprep.subr.bf16.mxu1 %v3429_v26 }
 0x125   :  { %1910 = vmatmul.mubr.bf16.vlgmr.msra.gmra.mrb[4].mxu1 %v3801_v33  ;;  %v3442_v33 = vld [vmem:[#allocation2 + $0x6a8] ss:$16 sps:$4 sm:$0xff]   ;;  %2418 = vmatpush1.bf16.msra.mxu0 %v3516_v52 }
 0x126   :  { %1921 = vmatpush1.bf16.msra.mxu1 %v3427_v27  ;;  %2944 = vmatprep.mubr.msk.bf16.mxu1 %vm1602_vm0, %v3735_v47  ;;  %v3534_v52 = vld [vmem:[#allocation5 + $0x150] ss:$8 sps:$4 sm:$0xff]  }
 0x127   :  { %1922 = vmatprep.subr.bf16.mxu1 %v3432_v28  ;;  %2430 = vmatprep.subr.bf16.mxu0 %v3521_v56  ;;  %v3540_v56 = vld [vmem:[#allocation5 + $0x170] ss:$8 sps:$4 sm:$0xff]  }
 0x12a   :  { %1923 = vmatpush1.bf16.msra.mxu1 %v3430_v29 }
 0x12b   :  { %1924 = vmatprep.subr.bf16.mxu1 %v3435_v30  ;;  %v3570_v30 = vld [vmem:[%s3920_s5 + $0x8] sm:$0xff]  }
 0x12e   :  { %1925 = vmatpush1.bf16.msra.mxu1 %v3433_v16 }
 0x12f   :  { %1926 = vmatprep.subr.bf16.mxu1 %v3438_v31  ;;  %v3571_v31 = vld [vmem:[%s3920_s5 + $0x50] sm:$0xff]  }
 0x132   :  { %1927 = vmatpush1.bf16.msra.mxu1 %v3436_v34 }
 0x133   :  { %1928 = vmatprep.subr.bf16.mxu1 %v3441_v35 }
 0x136   :  { %1929 = vmatpush1.bf16.msra.mxu1 %v3439_v36 }
 0x137   :  { %1930 = vmatprep.subr.bf16.mxu1 %v3444_v37 }
 0x138   :  { %v3808_v39 = vpop.f32.mrb[0].mxu1 }
 0x139   :  { %v3810_v47 = vpop.f32.mrb[1].mxu1 }
 0x13a   :  { %v3812_v40 = vpop.f32.mrb[2].mxu1  ;;  %1931 = vmatpush1.bf16.msra.mxu1 %v3442_v33 }
 0x13b   :  { %v3814_v25 = vpop.f32.mrb[3].mxu1  ;;  %1932 = vmatprep.subr.bf16.mxu1 %v3447_v38 }
 0x13e   :  { %1933 = vmatpush1.bf16.msra.mxu1 %v3445_v41  ;;  %v3573_v41 = vld [vmem:[%s3920_s5 + $0x58] sm:$0xff]  }
 0x13f   :  { %1934 = vmatprep.subr.bf16.mxu1 %v3450_v42  ;;  %v3574_v42 = vld [vmem:[%s3920_s5 + $0x18] sm:$0xff]  }
 0x142   :  { %1935 = vmatpush1.bf16.msra.mxu1 %v3448_v32  ;;  %v3525_v32 = vld [vmem:[#allocation5 + $0x120] ss:$8 sps:$4 sm:$0xff]  }
 0x143   :  { %1936 = vmatprep.subr.bf16.mxu1 %v3453_v45  ;;  %v3576_v45 = vld [vmem:[%s3920_s5 + $0x20] sm:$0xff]  }
 0x146   :  { %1937 = vmatpush1.bf16.msra.mxu1 %v3451_v49  ;;  %v3533_v49 = vld [vmem:[#allocation5 + $0x144] ss:$8 sps:$4 sm:$0xff]  }
 0x147   :  { %1938 = vmatprep.subr.bf16.mxu1 %v3456_v50  ;;  %v3531_v50 = vld [vmem:[#allocation5 + $0x140] ss:$8 sps:$4 sm:$0xff]  }
 0x14a   :  { %1939 = vmatpush1.bf16.msra.mxu1 %v3454_v53  ;;  %v3539_v53 = vld [vmem:[#allocation5 + $0x164] ss:$8 sps:$4 sm:$0xff]  }
 0x14b   :  { %1940 = vmatprep.subr.bf16.mxu1 %v3459_v54  ;;  %v3537_v54 = vld [vmem:[#allocation5 + $0x160] ss:$8 sps:$4 sm:$0xff]  }
 0x14e   :  { %1941 = vmatpush1.bf16.msra.mxu1 %v3457_v55  ;;  %v3542_v55 = vld [vmem:[#allocation5 + $0x174] ss:$8 sps:$4 sm:$0xff]  }
 0x14f   :  { %1942 = vmatprep.subr.bf16.mxu1 %v3462_v57  ;;  %v3545_v57 = vld [vmem:[#allocation5 + $0x184] ss:$8 sps:$4 sm:$0xff]  }
 0x152   :  { %1943 = vmatpush1.bf16.msra.mxu1 %v3460_v58  ;;  %v3543_v58 = vld [vmem:[#allocation5 + $0x180] ss:$8 sps:$4 sm:$0xff]  }
 0x153   :  { %1944 = vmatprep.subr.bf16.mxu1 %v3465_v59  ;;  %v3548_v59 = vld [vmem:[#allocation5 + $0x194] ss:$8 sps:$4 sm:$0xff]  }
 0x156   :  { %1945 = vmatpush1.bf16.msra.mxu1 %v3463_v60  ;;  %v3546_v60 = vld [vmem:[#allocation5 + $0x190] ss:$8 sps:$4 sm:$0xff]  }
 0x157   :  { %1946 = vmatprep.subr.bf16.mxu1 %v3468_v61  ;;  %v3551_v61 = vld [vmem:[#allocation5 + $0x1a4] ss:$8 sps:$4 sm:$0xff]  }
 0x15a   :  { %1947 = vmatpush1.bf16.msra.mxu1 %v3466_v63  ;;  %v3554_v63 = vld [vmem:[#allocation5 + $0x1b4] ss:$8 sps:$4 sm:$0xff]  }
 0x15b   :  { %2943 = vmatprep.subr.msk.bf16.mxu1 %vm1606_vm1, %v2940_v0  ;;  %v3552_v0 = vld [vmem:[#allocation5 + $0x1b0] ss:$8 sps:$4 sm:$0xff]  }
 0x15e   :  { %1949 = vmatpush1.bf16.msra.mxu1 %v1614_v2  ;;  %v3555_v2 = vld [vmem:[#allocation5 + $0x1c0] ss:$8 sps:$4 sm:$0xff]  }
 0x15f   :  { %3026 = vmatprep.subr.bf16.mxu1 %v3567_v21 }
 0x161   :  { %1953 = vmatmul.mubr.bf16.vlgmr.msra.gmra.mrb[4].mxu1 %v3753_v10  ;;  %v339_v10 = vrot.slane %v3825_v6, %v338_v7 }
 0x162   :  { %3027 = vmatpush3.bf16.msra.mxu1 %v3568_v22 }
 0x163   :  { %3028 = vmatprep.subr.bf16.mxu1 %v3569_v23 }
 0x166   :  { %3029 = vmatpush3.bf16.msra.mxu1 %v3570_v30 }
 0x167   :  { %3030 = vmatprep.subr.bf16.mxu1 %v3571_v31 }
 0x1bb   :  { %v1739_v9 = vpop.f32.mrb[0].mxu0 }
 0x1bc   :  { %v3048_v11 = vadd.f32 %v1739_v9, %v335_v8  ;;  %v1741_v12 = vpop.f32.mrb[1].mxu0  ;;  %v3561_v9 = vld [vmem:[#allocation5 + $0x1e0] ss:$8 sps:$4 sm:$0xff]  }
 0x1bd   :  { %v3050_v13 = vadd.f32 %v1741_v12, %v339_v10  ;;  %v1743_v14 = vpop.f32.mrb[2].mxu0  ;;  %v3564_v12 = vld [vmem:[#allocation5 + $0x1f0] ss:$8 sps:$4 sm:$0xff]  }
 0x1be   :  { %v3049_v15 = vadd.f32 %v3048_v11, %v3808_v39  ;;  %v3052_v17 = vadd.f32 %v1743_v14, %v335_v8  ;;  %v1745_v18 = vpop.f32.mrb[3].mxu0  ;;  %v3519_v39 = vld [vmem:[#allocation5 + $0x100] ss:$8 sps:$4 sm:$0xff]   ;;  %v3558_v8 = vld [vmem:[#allocation5 + $0x1d0] ss:$8 sps:$4 sm:$0xff]   ;;  %v346_v14 = vsub.s32 3, %v3819_v4 }
 0x1bf   :  { %v3051_v19 = vadd.f32 %v3050_v13, %v3810_v47  ;;  %v3054_v20 = vadd.f32 %v1745_v18, %v339_v10  ;;  %v3572_v47 = vld [vmem:[%s3920_s5 + $0x10] sm:$0xff]   ;;  %v3566_v11 = vld [vmem:[#allocation5 + $0x1f4] ss:$8 sps:$4 sm:$0xff]   ;;  %v342_v13 = vsub.s32 2, %v3819_v4 }
 0x1c0   :  { %v1971_v24 = vmul.f32 0.01, %v3049_v15  ;;  %v3053_v26 = vadd.f32 %v3052_v17, %v3812_v40  ;;  %vm1963_vm2 = vcmp.gt.f32.partialorder %v3049_v15, 0.0  ;;  %v3524_v40 = vld [vmem:[#allocation5 + $0x114] ss:$8 sps:$4 sm:$0xff]   ;;  %3031 = vmatpush3.bf16.msra.mxu1 %v3572_v47  ;;  %v347_v17 = vrot.slane %v3825_v6, %v346_v14  ;;  %v3581_v47 = vld [vmem:[%s3920_s5 + $0x78] sm:$0xff]  }
 0x1c1   :  { %v1972_v27 = vmul.f32 0.01, %v3051_v19  ;;  %v3055_v28 = vadd.f32 %v3054_v20, %v3814_v25  ;;  %vm1964_vm3 = vcmp.gt.f32.partialorder %v3051_v19, 0.0  ;;  %v3522_v25 = vld [vmem:[#allocation5 + $0x110] ss:$8 sps:$4 sm:$0xff]   ;;  %3032 = vmatprep.subr.bf16.mxu1 %v3573_v41 }
 0x1c2   :  { %vm1967_vm4 = vcmp.gt.f32.partialorder %v3053_v26, 0.0  ;;  %v1975_v29 = vmul.f32 0.01, %v3053_v26  ;;  %v1979_v34 = vsel %vm1963_vm2, %v3049_v15, %v1971_v24  ;;  %v3563_v10 = vld [vmem:[#allocation5 + $0x1e4] ss:$8 sps:$4 sm:$0xff]   ;;  %v343_v15 = vrot.slane %v3825_v6, %v342_v13 }
 0x1c3   :  { %vm1968_vm5 = vcmp.gt.f32.partialorder %v3055_v28, 0.0  ;;  %v1976_v16 = vmul.f32 0.01, %v3055_v28  ;;  %v1980_v36 = vsel %vm1964_vm3, %v3051_v19, %v1972_v27  ;;  %v2055_v41 = vld [vmem:[%s3919_s4] sm:$0x3] }
 0x1c4   :  { %v1983_v35 = vsel %vm1967_vm4, %v3053_v26, %v1975_v29  ;;  %3033 = vmatpush3.bf16.msra.mxu1 %v3574_v42  ;;  %v2064_v42 = vrot.slane %v2055_v41, %v338_v7 }
 0x1c5   :  { %v1984_v37 = vsel %vm1968_vm5, %v3055_v28, %v1976_v16  ;;  %v1987_v33 = vpack.c.bf16 %v1983_v35, %v1979_v34  ;;  %3034 = vmatprep.subr.bf16.mxu1 %v3575_v44 }
 0x1c6   :  { %v1988_v38 = vpack.c.bf16 %v1984_v37, %v1980_v36  ;;  %v3577_v37 = vld [vmem:[%s3920_s5 + $0x68] sm:$0xff]  }
 0x1c8   :  { %2419 = vmatprep.mubr.bf16.mxu0 %v1988_v38  ;;  %3035 = vmatpush3.bf16.msra.mxu1 %v3576_v45  ;;  %v3579_v38 = vld [vmem:[%s3920_s5 + $0x70] sm:$0xff]  }
 0x1c9   :  { %2420 = vmatmul.mubr.bf16.vlgmr.msra.gmra.mrb[4].mxu0 %v1987_v33  ;;  %v3578_v33 = vld [vmem:[%s3920_s5 + $0x28] sm:$0xff]   ;;  %3036 = vmatprep.subr.bf16.mxu1 %v3577_v37 }
 0x1ca   :  { %2431 = vmatpush1.bf16.msra.mxu0 %v3519_v39  ;;  %v3580_v39 = vld [vmem:[%s3920_s5 + $0x30] sm:$0xff]  }
 0x1cb   :  { %2432 = vmatprep.subr.bf16.mxu0 %v3524_v40  ;;  %v3582_v40 = vld [vmem:[%s3920_s5 + $0x38] sm:$0xff]  }
 0x1cc   :  { %3037 = vmatpush3.bf16.msra.mxu1 %v3578_v33 }
 0x1cd   :  { %3038 = vmatprep.subr.bf16.mxu1 %v3579_v38 }
 0x1ce   :  { %2433 = vmatpush1.bf16.msra.mxu0 %v3522_v25  ;;  %v2060_v25 = vrot.slane %v2055_v41, %v334_v5 }
 0x1cf   :  { %2434 = vmatprep.subr.bf16.mxu0 %v3527_v43 }
 0x1d0   :  { %3039 = vmatpush3.bf16.msra.mxu1 %v3580_v39 }
 0x1d1   :  { %3040 = vmatprep.subr.bf16.mxu1 %v3581_v47 }
 0x1d2   :  { %2435 = vmatpush1.bf16.msra.mxu0 %v3525_v32 }
 0x1d3   :  { %2436 = vmatprep.subr.bf16.mxu0 %v3530_v46 }
 0x1d4   :  { %3041 = vmatpush3.bf16.msra.mxu1 %v3582_v40 }
 0x1d6   :  { %2437 = vmatpush1.bf16.msra.mxu0 %v3528_v48 }
 0x1d7   :  { %2438 = vmatprep.subr.bf16.mxu0 %v3533_v49 }
 0x1da   :  { %2439 = vmatpush1.bf16.msra.mxu0 %v3531_v50 }
 0x1db   :  { %2440 = vmatprep.subr.bf16.mxu0 %v3536_v51 }
 0x1de   :  { %2441 = vmatpush1.bf16.msra.mxu0 %v3534_v52 }
 0x1df   :  { %2442 = vmatprep.subr.bf16.mxu0 %v3539_v53 }
 0x1e2   :  { %2443 = vmatpush1.bf16.msra.mxu0 %v3537_v54 }
 0x1e3   :  { %2444 = vmatprep.subr.bf16.mxu0 %v3542_v55 }
 0x1e6   :  { %2445 = vmatpush1.bf16.msra.mxu0 %v3540_v56 }
 0x1e7   :  { %2446 = vmatprep.subr.bf16.mxu0 %v3545_v57 }
 0x1ea   :  { %2447 = vmatpush1.bf16.msra.mxu0 %v3543_v58 }
 0x1eb   :  { %2448 = vmatprep.subr.bf16.mxu0 %v3548_v59  ;;  %v3009_v59 = vld [vmem:[%s3921_s6] ss:$0 sm:$0xff] }
 0x1ee   :  { %2449 = vmatpush1.bf16.msra.mxu0 %v3546_v60 }
 0x1ef   :  { %2450 = vmatprep.subr.bf16.mxu0 %v3551_v61 }
 0x1f2   :  { %2451 = vmatpush1.bf16.msra.mxu0 %v3549_v62 }
 0x1f3   :  { %2452 = vmatprep.subr.bf16.mxu0 %v3554_v63 }
 0x1f6   :  { %2453 = vmatpush1.bf16.msra.mxu0 %v3552_v0 }
 0x1f7   :  { %2454 = vmatprep.subr.bf16.mxu0 %v3557_v1 }
 0x1fa   :  { %2455 = vmatpush1.bf16.msra.mxu0 %v3555_v2 }
 0x1fb   :  { %2456 = vmatprep.subr.bf16.mxu0 %v3560_v3 }
 0x1fe   :  { %2457 = vmatpush1.bf16.msra.mxu0 %v3558_v8 }
 0x1ff   :  { %2458 = vmatprep.subr.bf16.mxu0 %v3563_v10 }
 0x202   :  { %2459 = vmatpush1.bf16.msra.mxu0 %v3561_v9 }
 0x203   :  { %2460 = vmatprep.subr.bf16.mxu0 %v3566_v11 }
 0x206   :  { %2461 = vmatpush1.bf16.msra.mxu0 %v3564_v12 }
 0x234   :  { %v1954_v18 = vpop.f32.mrb[4].mxu1 }
 0x235   :  { %v3056_v19 = vadd.f32 %v1954_v18, %v343_v15  ;;  %v1956_v20 = vpop.f32.mrb[5].mxu1 }
 0x236   :  { %v3057_v21 = vadd.f32 %v1956_v20, %v347_v17  ;;  %v1958_v22 = vpop.f32.mrb[6].mxu1 }
 0x237   :  { %v1973_v23 = vmul.f32 0.01, %v3056_v19  ;;  %v3058_v24 = vadd.f32 %v1958_v22, %v343_v15  ;;  %v1960_v26 = vpop.f32.mrb[7].mxu1  ;;  %vm1965_vm6 = vcmp.gt.f32.partialorder %v3056_v19, 0.0 }
 0x238   :  { %v1974_v27 = vmul.f32 0.01, %v3057_v21  ;;  %v3059_v28 = vadd.f32 %v1960_v26, %v347_v17  ;;  %vm1966_vm7 = vcmp.gt.f32.partialorder %v3057_v21, 0.0 }
 0x239   :  { %vm1969_vm8 = vcmp.gt.f32.partialorder %v3058_v24, 0.0  ;;  %v1977_v29 = vmul.f32 0.01, %v3058_v24  ;;  %v1981_v16 = vsel %vm1965_vm6, %v3056_v19, %v1973_v23 }
 0x23a   :  { %vm1970_vm9 = vcmp.gt.f32.partialorder %v3059_v28, 0.0  ;;  %v1978_v30 = vmul.f32 0.01, %v3059_v28  ;;  %v1982_v6 = vsel %vm1966_vm7, %v3057_v21, %v1974_v27 }
 0x23b   :  { %v1985_v31 = vsel %vm1969_vm8, %v3058_v24, %v1977_v29 }
 0x23c   :  { %v1989_v34 = vpack.c.bf16 %v1985_v31, %v1981_v16  ;;  %v1986_v35 = vsel %vm1970_vm9, %v3059_v28, %v1978_v30 }
 0x23d   :  { %v1990_v36 = vpack.c.bf16 %v1986_v35, %v1982_v6 }
 0x23f   :  { %2462 = vmatprep.mubr.bf16.mxu0 %v1990_v36 }
 0x240   :  { %2463 = vmatmul.mubr.bf16.vlgmr.msra.gmra.mrb[4].mxu0 %v1989_v34 }
 0x313   :  { %v2464_v43 = vpop.f32.mrb[4].mxu0 }
 0x314   :  { %v3060_v44 = vadd.f32 %v2464_v43, %v2060_v25  ;;  %v2466_v32 = vpop.f32.mrb[5].mxu0 }
 0x315   :  { %v3061_v45 = vadd.f32 %v2466_v32, %v2064_v42  ;;  %v2468_v46 = vpop.f32.mrb[6].mxu0 }
 0x316   :  { %v2477_v48 = vmul.f32 0.01, %v3060_v44  ;;  %v3062_v49 = vadd.f32 %v2468_v46, %v2060_v25  ;;  %v2470_v50 = vpop.f32.mrb[7].mxu0  ;;  %vm2473_vm10 = vcmp.gt.f32.partialorder %v3060_v44, 0.0 }
 0x317   :  { %v2478_v51 = vmul.f32 0.01, %v3061_v45  ;;  %v3063_v52 = vadd.f32 %v2470_v50, %v2064_v42  ;;  %vm2474_vm11 = vcmp.gt.f32.partialorder %v3061_v45, 0.0 }
 0x318   :  { %vm2475_vm12 = vcmp.gt.f32.partialorder %v3062_v49, 0.0  ;;  %v2479_v53 = vmul.f32 0.01, %v3062_v49  ;;  %v2481_v5 = vsel %vm2473_vm10, %v3060_v44, %v2477_v48 }
 0x319   :  { %vm2476_vm13 = vcmp.gt.f32.partialorder %v3063_v52, 0.0  ;;  %v2480_v54 = vmul.f32 0.01, %v3063_v52  ;;  %v2482_v7 = vsel %vm2474_vm11, %v3061_v45, %v2478_v51 }
 0x31a   :  { %v2483_v55 = vsel %vm2475_vm12, %v3062_v49, %v2479_v53 }
 0x31b   :  { %v2485_v4 = vpack.c.bf16 %v2483_v55, %v2481_v5  ;;  %v2484_v56 = vsel %vm2476_vm13, %v3063_v52, %v2480_v54 }
 0x31c   :  { %v2486_v57 = vpack.c.bf16 %v2484_v56, %v2482_v7 }
 0x31e   :  { %2654 = vmatprep.mubr.bf16.mxu1 %v2486_v57 }
 0x31f   :  { %2655 = vmatmul.mubr.bf16.vlgmr.msra.gmra.mrb[8].mxu1 %v2485_v4 }
 0x3f2   :  { %v3042_v58 = vpop.f32.mrb[8].mxu1 }
 0x3f3   :  { %v3043_v60 = vpop.f32.mrb[9].mxu1 }
 0x3f4   :  { %v3044_v61 = vadd.f32 %v3043_v60, %v3042_v58  ;;  %v3045_v62 = vpop.f32.mrb[10].mxu1 }
 0x3f5   :  { %v3046_v63 = vpop.f32.mrb[11].mxu1 }
 0x3f6   :  { %v2657_v0 = vadd.f32 %v3044_v61, %v3009_v59  ;;  %v3047_v1 = vadd.f32 %v3046_v63, %v3045_v62 }
 0x3f8   :  { %v2665_v2 = vmul.f32 0.01, %v2657_v0  ;;  %v2660_v3 = vadd.f32 %v3047_v1, %v3009_v59  ;;  %vm2663_vm14 = vcmp.gt.f32.partialorder %v2657_v0, 0.0 }
 0x3fa   :  { %v2666_v8 = vmul.f32 0.01, %v2660_v3  ;;  %vm2664_vm15 = vcmp.gt.f32.partialorder %v2660_v3, 0.0  ;;  %v2667_v10 = vsel %vm2663_vm14, %v2657_v0, %v2665_v2 }
 0x3fb   :  { %2669 = vst [vmem:[#allocation7] sm:$0xff] %v2667_v10 }
 0x3fc   :  { %v2668_v9 = vsel %vm2664_vm15, %v2660_v3, %v2666_v8 }
 0x3fd   :  { %2670 = vst [vmem:[#allocation7 + $0x8] sm:$0xff] %v2668_v9 }
 0x3fe   :  { %3638 = shalt.err (!%p3635_p6)
}
 0x3ff   :  { %s3639_s27 = scalar_lea.hbm %s3922_s7, 256 }
 0x400   :  { %p3640_p7 = scmp.ne.s32.totalorder %s3922_s7, %s3639_s27  ;;  %p3643_p8 = scmp.lt.u32.totalorder %s3639_s27, %s3922_s7 }
 0x402   :  { %p3645_p9 = pnand %p3643_p8, %p3640_p7 }
 0x404   :  { %3648 = shalt.err (!%p3645_p9)
}
 0x405   :  { %2682 = dma.vmem_to_hbm [thread:$0]  %s2677_s23, 256, %s3922_s7, [#allocation4], %s3659_s1, %s3659_s1, %s3660_s25  }
 0x406   :  { %3653 = dma.done.wait [#allocation4], 256  }
 0x407   :  { %3654 = vsyncadd [#allocation4], 4294967040 }
 0x408   :  { %2686 = vsyncpa [#allocation3], 1 }
 0x409   :  { %2687 = vsyncpa [#allocation6], 1 }
 0x40a   :  { %2688 = vsyncpa [#allocation4], 1 }

</bundles_post_ra>
